<compile_context>
chip_gen: v7x
topology: tpu7x:2x2x1
jax: 0.10.0
libtpu: 0.0.40
codegen_flags: <defaults>
</compile_context>

<pallas_src>
import functools

import jax
import jax.numpy as jnp
from jax.experimental import pallas as pl
from jax.experimental.pallas import tpu as pltpu

_BF16 = jnp.bfloat16


# ---------------------------------------------------------------------------
# In-kernel math helpers
# ---------------------------------------------------------------------------
def _layer_norm(x, gamma, beta, eps=1e-5):
    mean = jnp.mean(x, axis=-1, keepdims=True)
    var = jnp.mean((x - mean) ** 2, axis=-1, keepdims=True)
    return (x - mean) * jax.lax.rsqrt(var + eps) * gamma + beta


def _mm_nt(a_bf16, w_bf16):
    """(L, K) @ (N, K)^T -> (L, N); bf16 operands, f32 accumulation."""
    return jax.lax.dot_general(a_bf16, w_bf16, (((1,), (1,)), ((), ())),
                               preferred_element_type=jnp.float32)


def _proj_t(x_bf16, w_bf16, b_f32):
    """Transposed projection: (N, K) x (L, K) -> (N, L) + bias (N, 1)."""
    y = jax.lax.dot_general(w_bf16, x_bf16, (((1,), (1,)), ((), ())),
                            preferred_element_type=jnp.float32)
    return y + b_f32


def _mha_ln(q_resid, x_q, x_k, x_v, w_in, b_in, w_out, b_out, gamma, beta,
            mask, num_heads):
    """MultiHeadAttention (dropout=0) + residual + LayerNorm for one batch.

    q_resid: (Lq, D) f32  residual source (query without pos)
    x_q:     (Lq, D) f32  query + query_pos
    x_k:     (Lk, D) f32  key + key_pos
    x_v:     (Lk, D) f32  value (no pos)
    w_in:  (3D, D) bf16   b_in: (3D, 1) f32   (PyTorch in_proj layout)
    w_out: (D, D)  bf16   b_out/gamma/beta: (1, D) f32
    mask:  (Lq, Lk) f32 additive, or None
    """
    D = q_resid.shape[-1]
    H = num_heads
    dh = D // H
    scale = 1.0 / float(dh) ** 0.5

    xq = x_q.astype(_BF16)
    xk = x_k.astype(_BF16)
    xv = x_v.astype(_BF16)

    # Transposed projections (out_feature, L): full-D MXU contraction, and the
    # head split below is a leading-dim (sublane-block) reshape, never a
    # sub-128 lane slice.  Scale folded into Q.
    q_t = _proj_t(xq, w_in[0:D], b_in[0:D]) * scale            # (D, Lq)
    k_t = _proj_t(xk, w_in[D:2 * D], b_in[D:2 * D])            # (D, Lk)
    v_t = _proj_t(xv, w_in[2 * D:3 * D], b_in[2 * D:3 * D])    # (D, Lk)

    Lq = q_t.shape[-1]
    Lk = k_t.shape[-1]
    q_h = q_t.reshape(H, dh, Lq).astype(_BF16)
    k_h = k_t.reshape(H, dh, Lk).astype(_BF16)
    v_h = v_t.reshape(H, dh, Lk).astype(_BF16)

    # Scores: one head-batched dot_general -> (H, Lq, Lk).
    s = jax.lax.dot_general(q_h, k_h, (((1,), (1,)), ((0,), (0,))),
                            preferred_element_type=jnp.float32)
    if mask is not None:
        s = s + mask[None]
    s = s - jnp.max(s, axis=-1, keepdims=True)
    p = jnp.exp(s)
    p = p * pl.reciprocal(jnp.sum(p, axis=-1, keepdims=True), approx=True)

    # Per-head context, full-Lk contraction -> (H, Lq, dh).
    o = jax.lax.dot_general(p.astype(_BF16), v_h,
                            (((2,), (2,)), ((0,), (0,))),
                            preferred_element_type=jnp.float32)

    # Concat-of-heads -> (Lq, D), then a single full-width output projection.
    o_cat = jnp.concatenate([o[h] for h in range(H)], axis=-1).astype(_BF16)
    out = _mm_nt(o_cat, w_out) + b_out
    return _layer_norm(out + q_resid, gamma, beta)


def _ffn_ln(x, w1, b1, w2, b2, gamma, beta):
    h = jnp.maximum(_mm_nt(x.astype(_BF16), w1) + b1, 0.0)
    y = _mm_nt(h.astype(_BF16), w2) + b2
    return _layer_norm(y + x, gamma, beta)


# ---------------------------------------------------------------------------
# Fused decoder-layer kernel (one batch element per grid step)
# ---------------------------------------------------------------------------
def _decoder_layer_kernel(*args, num_heads, has_temp, has_mask):
    o_ref = args[-1]
    refs = args[:-1]
    q_ref, key_ref, qpos_ref, kpos_ref = refs[0:4]
    idx = 4
    if has_temp:
        tm_ref, tpos_ref = refs[idx], refs[idx + 1]
        idx += 2
    if has_mask:
        mask_ref = refs[idx]
        idx += 1
    (sa_win, sa_bin, sa_wout, sa_bout, sa_g, sa_b,
     ca_win, ca_bin, ca_wout, ca_bout, ca_g, ca_b,
     f_w1, f_b1, f_w2, f_b2, f_g, f_b) = refs[idx:]

    q = q_ref[0]            # (Lq, D) f32
    key = key_ref[0]        # (Lk, D) f32
    q_pos = qpos_ref[0]
    k_pos = kpos_ref[0]

    if has_temp:
        temp_kv = jnp.concatenate([q, tm_ref[0]], axis=0)
        t_pos = jnp.concatenate([q_pos, tpos_ref[0]], axis=0)
    else:
        temp_kv, t_pos = q, q_pos
    mask = mask_ref[0] if has_mask else None

    # self-attention + residual + LayerNorm
    q = _mha_ln(q, q + q_pos, temp_kv + t_pos, temp_kv,
                sa_win[...], sa_bin[...], sa_wout[...], sa_bout[...],
                sa_g[...], sa_b[...], mask, num_heads)

    # cross-attention (attn_mask=None in the PyTorch module) + residual + LN
    q = _mha_ln(q, q + q_pos, key + k_pos, key,
                ca_win[...], ca_bin[...], ca_wout[...], ca_bout[...],
                ca_g[...], ca_b[...], None, num_heads)

    # FFN + residual + LayerNorm
    o_ref[0] = _ffn_ln(q, f_w1[...], f_b1[...], f_w2[...], f_b2[...],
                       f_g[...], f_b[...])


# ---------------------------------------------------------------------------
# pallas_call wrapper
# ---------------------------------------------------------------------------
def _per_batch_spec(shape):
    nd = len(shape)
    return pl.BlockSpec((1,) + tuple(shape[1:]),
                        lambda b, _nd=nd: (b,) + (0,) * (_nd - 1))


def _shared_spec(shape):
    nd = len(shape)
    return pl.BlockSpec(tuple(shape), lambda b, _nd=nd: (0,) * _nd)


def decoder_layer_block(query, key, query_pos, key_pos, attn_mask,
                        temp_memory, temp_pos, kp, num_heads,
                        vmem_limit_bytes=48 * 1024 * 1024):
    B, Lq, D = query.shape
    if query_pos is None:
        query_pos = jnp.zeros_like(query)
    if key_pos is None:
        key_pos = jnp.zeros_like(key)
    has_temp = temp_memory is not None
    has_mask = attn_mask is not None

    act_args = [query, key, query_pos, key_pos]
    if has_temp:
        act_args += [temp_memory, temp_pos]
    if has_mask:                      # additive float mask, shape (B, Lq, Lk)
        act_args += [attn_mask.astype(jnp.float32)]

    wt_args = [
        kp["sa"]["w_in"], kp["sa"]["b_in"], kp["sa"]["w_out"], kp["sa"]["b_out"],
        kp["sa"]["gamma"], kp["sa"]["beta"],
        kp["ca"]["w_in"], kp["ca"]["b_in"], kp["ca"]["w_out"], kp["ca"]["b_out"],
        kp["ca"]["gamma"], kp["ca"]["beta"],
        kp["ffn"]["w1"], kp["ffn"]["b1"], kp["ffn"]["w2"], kp["ffn"]["b2"],
        kp["ffn"]["gamma"], kp["ffn"]["beta"],
    ]

    in_specs = ([_per_batch_spec(a.shape) for a in act_args]
                + [_shared_spec(a.shape) for a in wt_args])

    kernel = functools.partial(_decoder_layer_kernel, num_heads=num_heads,
                               has_temp=has_temp, has_mask=has_mask)
    return pl.pallas_call(
        kernel,
        out_shape=jax.ShapeDtypeStruct((B, Lq, D), jnp.float32),
        grid=(B,),
        in_specs=in_specs,
        out_specs=_per_batch_spec((B, Lq, D)),
        compiler_params=pltpu.CompilerParams(
            dimension_semantics=("parallel",),
            vmem_limit_bytes=vmem_limit_bytes),
    )(*act_args, *wt_args)


def petr_temporal_transformer(query, key, query_pos, key_pos, attn_mask,
                              temp_memory, temp_pos, packed_params, num_heads):
    outs = []
    for kp in packed_params:
        query = decoder_layer_block(query, key, query_pos, key_pos, attn_mask,
                                    temp_memory, temp_pos, kp, num_heads)
        outs.append(query)
    return jnp.stack(outs, axis=0)      # [num_layers, B, Lq, D]


# ---------------------------------------------------------------------------
# Deterministic parameter init (synthetic; no checkpoint) + kernel packing
# ---------------------------------------------------------------------------
def _xavier(key, shape):
    fan_out, fan_in = shape
    limit = (6.0 / (fan_in + fan_out)) ** 0.5
    return jax.random.uniform(key, shape, jnp.float32, -limit, limit)


def init_params(key, num_layers, D, F):
    params = []
    for i in range(num_layers):
        lk = jax.random.fold_in(key, i)
        ks = jax.random.split(lk, 6)

        def attn_params(k):
            k1, k2, k3, k4 = jax.random.split(k, 4)
            return {
                "in_w": _xavier(k1, (3 * D, D)),
                "in_b": 0.01 * jax.random.normal(k2, (1, 3 * D), jnp.float32),
                "out_w": _xavier(k3, (D, D)),
                "out_b": 0.01 * jax.random.normal(k4, (1, D), jnp.float32),
                "gamma": jnp.ones((1, D), jnp.float32),
                "beta": jnp.zeros((1, D), jnp.float32),
            }

        params.append({
            "self_attn": attn_params(ks[0]),
            "cross_attn": attn_params(ks[1]),
            "ffn": {
                "w1": _xavier(ks[2], (F, D)),
                "b1": 0.01 * jax.random.normal(ks[3], (1, F), jnp.float32),
                "w2": _xavier(ks[4], (D, F)),
                "b2": 0.01 * jax.random.normal(ks[5], (1, D), jnp.float32),
                "gamma": jnp.ones((1, D), jnp.float32),
                "beta": jnp.zeros((1, D), jnp.float32),
            },
        })
    return params


def pack_params(params):
    """Cast matmul weights to bf16 and reshape biases for the kernel layout."""
    def pack_attn(a):
        return {
            "w_in": a["in_w"].astype(_BF16),            # (3D, D) bf16
            "b_in": a["in_b"].reshape(-1, 1),            # (3D, 1) f32
            "w_out": a["out_w"].astype(_BF16),           # (D, D)  bf16
            "b_out": a["out_b"],                         # (1, D)  f32
            "gamma": a["gamma"], "beta": a["beta"],
        }

    packed = []
    for lp in params:
        packed.append({
            "sa": pack_attn(lp["self_attn"]),
            "ca": pack_attn(lp["cross_attn"]),
            "ffn": {
                "w1": lp["ffn"]["w1"].astype(_BF16),
                "b1": lp["ffn"]["b1"],
                "w2": lp["ffn"]["w2"].astype(_BF16),
                "b2": lp["ffn"]["b2"],
                "gamma": lp["ffn"]["gamma"], "beta": lp["ffn"]["beta"],
            },
        })
    return packed


# ---------------------------------------------------------------------------
# Pure-JAX reference (bf16 matmuls / f32 accumulation, same as the kernel)
# ---------------------------------------------------------------------------
def _ref_mha_ln(q, kv, qpos, kpos, mask, p, num_heads):
    B, Lq, D = q.shape
    Lk = kv.shape[1]
    dh = D // num_heads
    scale = 1.0 / float(dh) ** 0.5
    xq = (q + qpos).astype(_BF16)
    xk = (kv + kpos).astype(_BF16)
    xv = kv.astype(_BF16)
    W = p["in_w"].astype(_BF16)
    b = p["in_b"][0]
    Q = jnp.einsum("bld,ed->ble", xq, W[:D],
                   preferred_element_type=jnp.float32) + b[:D]
    K = jnp.einsum("bld,ed->ble", xk, W[D:2 * D],
                   preferred_element_type=jnp.float32) + b[D:2 * D]
    V = jnp.einsum("bld,ed->ble", xv, W[2 * D:],
                   preferred_element_type=jnp.float32) + b[2 * D:]
    Qh = (Q * scale).reshape(B, Lq, num_heads, dh).transpose(0, 2, 1, 3)
    Kh = K.reshape(B, Lk, num_heads, dh).transpose(0, 2, 1, 3)
    Vh = V.reshape(B, Lk, num_heads, dh).transpose(0, 2, 1, 3)
    s = jnp.einsum("bhqd,bhkd->bhqk", Qh.astype(_BF16), Kh.astype(_BF16),
                   preferred_element_type=jnp.float32)
    if mask is not None:
        s = s + mask[:, None]
    a = jax.nn.softmax(s, axis=-1)
    o = jnp.einsum("bhqk,bhkd->bhqd", a.astype(_BF16), Vh.astype(_BF16),
                   preferred_element_type=jnp.float32)
    o = o.transpose(0, 2, 1, 3).reshape(B, Lq, D)
    out = jnp.einsum("bld,ed->ble", o.astype(_BF16), p["out_w"].astype(_BF16),
                     preferred_element_type=jnp.float32) + p["out_b"][0]
    return _layer_norm(out + q, p["gamma"][0], p["beta"][0])


def _ref_ffn_ln(x, p):
    h = jax.nn.relu(
        jnp.einsum("bld,fd->blf", x.astype(_BF16), p["w1"].astype(_BF16),
                   preferred_element_type=jnp.float32) + p["b1"][0])
    y = jnp.einsum("blf,df->bld", h.astype(_BF16), p["w2"].astype(_BF16),
                   preferred_element_type=jnp.float32) + p["b2"][0]
    return _layer_norm(y + x, p["gamma"][0], p["beta"][0])


def _ref_transformer(query, key, query_pos, key_pos, attn_mask,
                     temp_memory, temp_pos, params, num_heads):
    outs = []
    for lp in params:
        if temp_memory is not None:
            temp_key = jnp.concatenate([query, temp_memory], axis=1)
            t_pos = jnp.concatenate([query_pos, temp_pos], axis=1)
        else:
            temp_key, t_pos = query, query_pos
        query = _ref_mha_ln(query, temp_key, query_pos, t_pos, attn_mask,
                            lp["self_attn"], num_heads)
        query = _ref_mha_ln(query, key, query_pos, key_pos, None,
                            lp["cross_attn"], num_heads)
        query = _ref_ffn_ln(query, lp["ffn"])
        outs.append(query)
    return jnp.stack(outs, axis=0)


# ---------------------------------------------------------------------------
if __name__ == "__main__":
    # TODO(synk): dropout / torch.utils.checkpoint / the fp16 CUDA FlashMHA
    # path are training- or device-specific; dropout defaults to 0.0 so the
    # eval-time math is reproduced exactly (bf16 MXU, f32 accumulation).
    B, Lq, Lk, Lt = 2, 8, 16, 4
    D, H, F = 32, 4, 64
    num_layers = 2

    root = jax.random.PRNGKey(0)
    keys = jax.random.split(root, 7)
    query = jax.random.normal(keys[0], (B, Lq, D), jnp.float32)
    key_feat = jax.random.normal(keys[1], (B, Lk, D), jnp.float32)
    query_pos = jax.random.normal(keys[2], (B, Lq, D), jnp.float32)
    key_pos = jax.random.normal(keys[3], (B, Lk, D), jnp.float32)
    temp_memory = jax.random.normal(keys[4], (B, Lt, D), jnp.float32)
    temp_pos = jax.random.normal(keys[5], (B, Lt, D), jnp.float32)

    params = init_params(keys[6], num_layers, D, F)
    packed = pack_params(params)

    out = petr_temporal_transformer(query, key_feat, query_pos, key_pos,
                                    None, temp_memory, temp_pos, packed, H)
    out = jax.block_until_ready(out)
    assert out.shape == (num_layers, B, Lq, D)

    ref = _ref_transformer(query, key_feat, query_pos, key_pos,
                           None, temp_memory, temp_pos, params, H)
    assert jnp.allclose(out, ref, atol=2e-2, rtol=2e-2), (
        "Pallas output mismatch vs. reference")

    print("KERNEL_OK")
</pallas_src>

<mosaic_0001>
module attributes {stable_mosaic.version = 11 : i64} {
  func.func @_decoder_layer_kernel(%arg0: i32, %arg1: memref<1x8x32xf32, #tpu.memory_space<vmem>>, %arg2: memref<1x16x32xf32, #tpu.memory_space<vmem>>, %arg3: memref<1x8x32xf32, #tpu.memory_space<vmem>>, %arg4: memref<1x16x32xf32, #tpu.memory_space<vmem>>, %arg5: memref<1x4x32xf32, #tpu.memory_space<vmem>>, %arg6: memref<1x4x32xf32, #tpu.memory_space<vmem>>, %arg7: memref<96x32xbf16, #tpu.memory_space<vmem>>, %arg8: memref<96x1xf32, #tpu.memory_space<vmem>>, %arg9: memref<32x32xbf16, #tpu.memory_space<vmem>>, %arg10: memref<1x32xf32, #tpu.memory_space<vmem>>, %arg11: memref<1x32xf32, #tpu.memory_space<vmem>>, %arg12: memref<1x32xf32, #tpu.memory_space<vmem>>, %arg13: memref<96x32xbf16, #tpu.memory_space<vmem>>, %arg14: memref<96x1xf32, #tpu.memory_space<vmem>>, %arg15: memref<32x32xbf16, #tpu.memory_space<vmem>>, %arg16: memref<1x32xf32, #tpu.memory_space<vmem>>, %arg17: memref<1x32xf32, #tpu.memory_space<vmem>>, %arg18: memref<1x32xf32, #tpu.memory_space<vmem>>, %arg19: memref<64x32xbf16, #tpu.memory_space<vmem>>, %arg20: memref<1x64xf32, #tpu.memory_space<vmem>>, %arg21: memref<32x64xbf16, #tpu.memory_space<vmem>>, %arg22: memref<1x32xf32, #tpu.memory_space<vmem>>, %arg23: memref<1x32xf32, #tpu.memory_space<vmem>>, %arg24: memref<1x32xf32, #tpu.memory_space<vmem>>, %arg25: memref<1x8x32xf32, #tpu.memory_space<vmem>>) attributes {dimension_semantics = [#tpu.dimension_semantics<parallel>], iteration_bounds = array<i64: 2>, scalar_prefetch = 0 : i64, scratch_operands = 0 : i64, tpu.core_type = #tpu.core_type<tc>, window_params = [{transform_indices = @transform_0, window_bounds = array<i64: 1, 8, 32>}, {transform_indices = @transform_1, window_bounds = array<i64: 1, 16, 32>}, {transform_indices = @transform_2, window_bounds = array<i64: 1, 8, 32>}, {transform_indices = @transform_3, window_bounds = array<i64: 1, 16, 32>}, {transform_indices = @transform_4, window_bounds = array<i64: 1, 4, 32>}, {transform_indices = @transform_5, window_bounds = array<i64: 1, 4, 32>}, {pipeline_mode = #tpu.pipeline_mode<synchronous>, transform_indices = @transform_6, window_bounds = array<i64: 96, 32>}, {pipeline_mode = #tpu.pipeline_mode<synchronous>, transform_indices = @transform_7, window_bounds = array<i64: 96, 1>}, {pipeline_mode = #tpu.pipeline_mode<synchronous>, transform_indices = @transform_8, window_bounds = array<i64: 32, 32>}, {pipeline_mode = #tpu.pipeline_mode<synchronous>, transform_indices = @transform_9, window_bounds = array<i64: 1, 32>}, {pipeline_mode = #tpu.pipeline_mode<synchronous>, transform_indices = @transform_10, window_bounds = array<i64: 1, 32>}, {pipeline_mode = #tpu.pipeline_mode<synchronous>, transform_indices = @transform_11, window_bounds = array<i64: 1, 32>}, {pipeline_mode = #tpu.pipeline_mode<synchronous>, transform_indices = @transform_12, window_bounds = array<i64: 96, 32>}, {pipeline_mode = #tpu.pipeline_mode<synchronous>, transform_indices = @transform_13, window_bounds = array<i64: 96, 1>}, {pipeline_mode = #tpu.pipeline_mode<synchronous>, transform_indices = @transform_14, window_bounds = array<i64: 32, 32>}, {pipeline_mode = #tpu.pipeline_mode<synchronous>, transform_indices = @transform_15, window_bounds = array<i64: 1, 32>}, {pipeline_mode = #tpu.pipeline_mode<synchronous>, transform_indices = @transform_16, window_bounds = array<i64: 1, 32>}, {pipeline_mode = #tpu.pipeline_mode<synchronous>, transform_indices = @transform_17, window_bounds = array<i64: 1, 32>}, {pipeline_mode = #tpu.pipeline_mode<synchronous>, transform_indices = @transform_18, window_bounds = array<i64: 64, 32>}, {pipeline_mode = #tpu.pipeline_mode<synchronous>, transform_indices = @transform_19, window_bounds = array<i64: 1, 64>}, {pipeline_mode = #tpu.pipeline_mode<synchronous>, transform_indices = @transform_20, window_bounds = array<i64: 32, 64>}, {pipeline_mode = #tpu.pipeline_mode<synchronous>, transform_indices = @transform_21, window_bounds = array<i64: 1, 32>}, {pipeline_mode = #tpu.pipeline_mode<synchronous>, transform_indices = @transform_22, window_bounds = array<i64: 1, 32>}, {pipeline_mode = #tpu.pipeline_mode<synchronous>, transform_indices = @transform_23, window_bounds = array<i64: 1, 32>}, {transform_indices = @transform_24, window_bounds = array<i64: 1, 8, 32>}]} {
    %c0 = arith.constant 0 : index
    %c0_0 = arith.constant 0 : index
    %c0_1 = arith.constant 0 : index
    %0 = vector.load %arg1[%c0, %c0_0, %c0_1] : memref<1x8x32xf32, #tpu.memory_space<vmem>>, vector<1x8x32xf32>
    %1 = vector.shape_cast %0 : vector<1x8x32xf32> to vector<8x32xf32>
    %c0_2 = arith.constant 0 : index
    %c0_3 = arith.constant 0 : index
    %c0_4 = arith.constant 0 : index
    %2 = vector.load %arg2[%c0_2, %c0_3, %c0_4] : memref<1x16x32xf32, #tpu.memory_space<vmem>>, vector<1x16x32xf32>
    %3 = vector.shape_cast %2 : vector<1x16x32xf32> to vector<16x32xf32>
    %c0_5 = arith.constant 0 : index
    %c0_6 = arith.constant 0 : index
    %c0_7 = arith.constant 0 : index
    %4 = vector.load %arg3[%c0_5, %c0_6, %c0_7] : memref<1x8x32xf32, #tpu.memory_space<vmem>>, vector<1x8x32xf32>
    %5 = vector.shape_cast %4 : vector<1x8x32xf32> to vector<8x32xf32>
    %c0_8 = arith.constant 0 : index
    %c0_9 = arith.constant 0 : index
    %c0_10 = arith.constant 0 : index
    %6 = vector.load %arg4[%c0_8, %c0_9, %c0_10] : memref<1x16x32xf32, #tpu.memory_space<vmem>>, vector<1x16x32xf32>
    %7 = vector.shape_cast %6 : vector<1x16x32xf32> to vector<16x32xf32>
    %c0_11 = arith.constant 0 : index
    %c0_12 = arith.constant 0 : index
    %c0_13 = arith.constant 0 : index
    %8 = vector.load %arg5[%c0_11, %c0_12, %c0_13] : memref<1x4x32xf32, #tpu.memory_space<vmem>>, vector<1x4x32xf32>
    %9 = vector.shape_cast %8 : vector<1x4x32xf32> to vector<4x32xf32>
    %10 = tpu.concatenate %1, %9 in 0 : vector<8x32xf32>, vector<4x32xf32> -> vector<12x32xf32>
    %c0_14 = arith.constant 0 : index
    %c0_15 = arith.constant 0 : index
    %c0_16 = arith.constant 0 : index
    %11 = vector.load %arg6[%c0_14, %c0_15, %c0_16] : memref<1x4x32xf32, #tpu.memory_space<vmem>>, vector<1x4x32xf32>
    %12 = vector.shape_cast %11 : vector<1x4x32xf32> to vector<4x32xf32>
    %13 = tpu.concatenate %5, %12 in 0 : vector<8x32xf32>, vector<4x32xf32> -> vector<12x32xf32>
    %14 = arith.addf %1, %5 : vector<8x32xf32>
    %15 = arith.addf %10, %13 : vector<12x32xf32>
    %c0_17 = arith.constant 0 : index
    %c0_18 = arith.constant 0 : index
    %16 = vector.load %arg7[%c0_17, %c0_18] : memref<96x32xbf16, #tpu.memory_space<vmem>>, vector<96x32xbf16>
    %c0_19 = arith.constant 0 : index
    %c0_20 = arith.constant 0 : index
    %17 = vector.load %arg8[%c0_19, %c0_20] : memref<96x1xf32, #tpu.memory_space<vmem>>, vector<96x1xf32>
    %c0_21 = arith.constant 0 : index
    %c0_22 = arith.constant 0 : index
    %18 = vector.load %arg9[%c0_21, %c0_22] : memref<32x32xbf16, #tpu.memory_space<vmem>>, vector<32x32xbf16>
    %c0_23 = arith.constant 0 : index
    %c0_24 = arith.constant 0 : index
    %19 = vector.load %arg10[%c0_23, %c0_24] : memref<1x32xf32, #tpu.memory_space<vmem>>, vector<1x32xf32>
    %c0_25 = arith.constant 0 : index
    %c0_26 = arith.constant 0 : index
    %20 = vector.load %arg11[%c0_25, %c0_26] : memref<1x32xf32, #tpu.memory_space<vmem>>, vector<1x32xf32>
    %c0_27 = arith.constant 0 : index
    %c0_28 = arith.constant 0 : index
    %21 = vector.load %arg12[%c0_27, %c0_28] : memref<1x32xf32, #tpu.memory_space<vmem>>, vector<1x32xf32>
    %22 = arith.truncf %14 : vector<8x32xf32> to vector<8x32xbf16>
    %23 = arith.truncf %15 : vector<12x32xf32> to vector<12x32xbf16>
    %24 = arith.truncf %10 : vector<12x32xf32> to vector<12x32xbf16>
    %25 = vector.extract_strided_slice %16 {offsets = [0, 0], sizes = [32, 32], strides = [1, 1]} : vector<96x32xbf16> to vector<32x32xbf16>
    %26 = vector.extract_strided_slice %17 {offsets = [0, 0], sizes = [32, 1], strides = [1, 1]} : vector<96x1xf32> to vector<32x1xf32>
    %cst = arith.constant dense<0.000000e+00> : vector<32x8xf32>
    %27 = tpu.matmul %25, %22, %cst {dimension_numbers = #tpu.dot_dimension_numbers<[1], [1], [0], [0], [0, 0, 1, 0], [], []>} : vector<32x32xbf16>, vector<8x32xbf16>, vector<32x8xf32> -> vector<32x8xf32>
    %28 = vector.broadcast %26 : vector<32x1xf32> to vector<32x8xf32>
    %29 = arith.addf %27, %28 : vector<32x8xf32>
    %cst_29 = arith.constant 0.353553385 : f32
    %30 = vector.broadcast %cst_29 : f32 to vector<32x8xf32>
    %31 = arith.mulf %29, %30 : vector<32x8xf32>
    %32 = vector.extract_strided_slice %16 {offsets = [32, 0], sizes = [32, 32], strides = [1, 1]} : vector<96x32xbf16> to vector<32x32xbf16>
    %33 = vector.extract_strided_slice %17 {offsets = [32, 0], sizes = [32, 1], strides = [1, 1]} : vector<96x1xf32> to vector<32x1xf32>
    %cst_30 = arith.constant dense<0.000000e+00> : vector<32x12xf32>
    %34 = tpu.matmul %32, %23, %cst_30 {dimension_numbers = #tpu.dot_dimension_numbers<[1], [1], [0], [0], [0, 0, 1, 0], [], []>} : vector<32x32xbf16>, vector<12x32xbf16>, vector<32x12xf32> -> vector<32x12xf32>
    %35 = vector.broadcast %33 : vector<32x1xf32> to vector<32x12xf32>
    %36 = arith.addf %34, %35 : vector<32x12xf32>
    %37 = vector.extract_strided_slice %16 {offsets = [64, 0], sizes = [32, 32], strides = [1, 1]} : vector<96x32xbf16> to vector<32x32xbf16>
    %38 = vector.extract_strided_slice %17 {offsets = [64, 0], sizes = [32, 1], strides = [1, 1]} : vector<96x1xf32> to vector<32x1xf32>
    %cst_31 = arith.constant dense<0.000000e+00> : vector<32x12xf32>
    %39 = tpu.matmul %37, %24, %cst_31 {dimension_numbers = #tpu.dot_dimension_numbers<[1], [1], [0], [0], [0, 0, 1, 0], [], []>} : vector<32x32xbf16>, vector<12x32xbf16>, vector<32x12xf32> -> vector<32x12xf32>
    %40 = vector.broadcast %38 : vector<32x1xf32> to vector<32x12xf32>
    %41 = arith.addf %39, %40 : vector<32x12xf32>
    %42 = vector.shape_cast %31 : vector<32x8xf32> to vector<4x8x8xf32>
    %43 = arith.truncf %42 : vector<4x8x8xf32> to vector<4x8x8xbf16>
    %44 = vector.shape_cast %36 : vector<32x12xf32> to vector<4x8x12xf32>
    %45 = arith.truncf %44 : vector<4x8x12xf32> to vector<4x8x12xbf16>
    %46 = vector.shape_cast %41 : vector<32x12xf32> to vector<4x8x12xf32>
    %47 = arith.truncf %46 : vector<4x8x12xf32> to vector<4x8x12xbf16>
    %cst_32 = arith.constant dense<0.000000e+00> : vector<4x8x12xf32>
    %48 = tpu.matmul %43, %45, %cst_32 {dimension_numbers = #tpu.dot_dimension_numbers<[1], [1], [2], [2], [0, 0, 0, 2, 1, 2], [0], [0]>} : vector<4x8x8xbf16>, vector<4x8x12xbf16>, vector<4x8x12xf32> -> vector<4x8x12xf32>
    %cst_33 = arith.constant dense<0xFF800000> : vector<4x8xf32>
    %49 = vector.multi_reduction <maximumf>, %48, %cst_33 [2] : vector<4x8x12xf32> to vector<4x8xf32>
    %50 = vector.shape_cast %49 : vector<4x8xf32> to vector<4x8x1xf32>
    %51 = vector.broadcast %50 : vector<4x8x1xf32> to vector<4x8x12xf32>
    %52 = arith.subf %48, %51 : vector<4x8x12xf32>
    %53 = math.exp %52 : vector<4x8x12xf32>
    %cst_34 = arith.constant dense<0.000000e+00> : vector<4x8xf32>
    %54 = vector.multi_reduction <add>, %53, %cst_34 [2] : vector<4x8x12xf32> to vector<4x8xf32>
    %55 = vector.shape_cast %54 : vector<4x8xf32> to vector<4x8x1xf32>
    %56 = tpu.reciprocal %55 {approx = true} : vector<4x8x1xf32> -> vector<4x8x1xf32>
    %57 = vector.broadcast %56 : vector<4x8x1xf32> to vector<4x8x12xf32>
    %58 = arith.mulf %53, %57 : vector<4x8x12xf32>
    %59 = arith.truncf %58 : vector<4x8x12xf32> to vector<4x8x12xbf16>
    %cst_35 = arith.constant dense<0.000000e+00> : vector<4x8x8xf32>
    %60 = tpu.matmul %59, %47, %cst_35 {dimension_numbers = #tpu.dot_dimension_numbers<[2], [2], [1], [1], [0, 0, 0, 1, 1, 1], [0], [0]>} : vector<4x8x12xbf16>, vector<4x8x12xbf16>, vector<4x8x8xf32> -> vector<4x8x8xf32>
    %61 = vector.extract_strided_slice %60 {offsets = [0, 0, 0], sizes = [1, 8, 8], strides = [1, 1, 1]} : vector<4x8x8xf32> to vector<1x8x8xf32>
    %62 = vector.shape_cast %61 : vector<1x8x8xf32> to vector<8x8xf32>
    %63 = vector.extract_strided_slice %60 {offsets = [1, 0, 0], sizes = [1, 8, 8], strides = [1, 1, 1]} : vector<4x8x8xf32> to vector<1x8x8xf32>
    %64 = vector.shape_cast %63 : vector<1x8x8xf32> to vector<8x8xf32>
    %65 = vector.extract_strided_slice %60 {offsets = [2, 0, 0], sizes = [1, 8, 8], strides = [1, 1, 1]} : vector<4x8x8xf32> to vector<1x8x8xf32>
    %66 = vector.shape_cast %65 : vector<1x8x8xf32> to vector<8x8xf32>
    %67 = vector.extract_strided_slice %60 {offsets = [3, 0, 0], sizes = [1, 8, 8], strides = [1, 1, 1]} : vector<4x8x8xf32> to vector<1x8x8xf32>
    %68 = vector.shape_cast %67 : vector<1x8x8xf32> to vector<8x8xf32>
    %69 = tpu.concatenate %62, %64, %66, %68 in 1 : vector<8x8xf32>, vector<8x8xf32>, vector<8x8xf32>, vector<8x8xf32> -> vector<8x32xf32>
    %70 = arith.truncf %69 : vector<8x32xf32> to vector<8x32xbf16>
    %cst_36 = arith.constant dense<0.000000e+00> : vector<8x32xf32>
    %71 = tpu.matmul %70, %18, %cst_36 {dimension_numbers = #tpu.dot_dimension_numbers<[1], [1], [0], [0], [0, 0, 1, 0], [], []>} : vector<8x32xbf16>, vector<32x32xbf16>, vector<8x32xf32> -> vector<8x32xf32>
    %72 = vector.broadcast %19 : vector<1x32xf32> to vector<8x32xf32>
    %73 = arith.addf %71, %72 : vector<8x32xf32>
    %74 = arith.addf %73, %1 : vector<8x32xf32>
    %cst_37 = arith.constant dense<0.000000e+00> : vector<8xf32>
    %75 = vector.multi_reduction <add>, %74, %cst_37 [1] : vector<8x32xf32> to vector<8xf32>
    %76 = vector.shape_cast %75 : vector<8xf32> to vector<8x1xf32>
    %cst_38 = arith.constant 3.200000e+01 : f32
    %77 = vector.broadcast %cst_38 : f32 to vector<8x1xf32>
    %78 = arith.divf %76, %77 : vector<8x1xf32>
    %79 = vector.broadcast %78 : vector<8x1xf32> to vector<8x32xf32>
    %80 = arith.subf %74, %79 : vector<8x32xf32>
    %81 = arith.mulf %80, %80 : vector<8x32xf32>
    %cst_39 = arith.constant dense<0.000000e+00> : vector<8xf32>
    %82 = vector.multi_reduction <add>, %81, %cst_39 [1] : vector<8x32xf32> to vector<8xf32>
    %83 = vector.shape_cast %82 : vector<8xf32> to vector<8x1xf32>
    %cst_40 = arith.constant 3.200000e+01 : f32
    %84 = vector.broadcast %cst_40 : f32 to vector<8x1xf32>
    %85 = arith.divf %83, %84 : vector<8x1xf32>
    %86 = vector.broadcast %78 : vector<8x1xf32> to vector<8x32xf32>
    %87 = arith.subf %74, %86 : vector<8x32xf32>
    %cst_41 = arith.constant 9.99999974E-6 : f32
    %88 = vector.broadcast %cst_41 : f32 to vector<8x1xf32>
    %89 = arith.addf %85, %88 : vector<8x1xf32>
    %90 = math.rsqrt %89 : vector<8x1xf32>
    %91 = vector.broadcast %90 : vector<8x1xf32> to vector<8x32xf32>
    %92 = arith.mulf %87, %91 : vector<8x32xf32>
    %93 = vector.broadcast %20 : vector<1x32xf32> to vector<8x32xf32>
    %94 = arith.mulf %92, %93 : vector<8x32xf32>
    %95 = vector.broadcast %21 : vector<1x32xf32> to vector<8x32xf32>
    %96 = arith.addf %94, %95 : vector<8x32xf32>
    %97 = arith.addf %96, %5 : vector<8x32xf32>
    %98 = arith.addf %3, %7 : vector<16x32xf32>
    %c0_42 = arith.constant 0 : index
    %c0_43 = arith.constant 0 : index
    %99 = vector.load %arg13[%c0_42, %c0_43] : memref<96x32xbf16, #tpu.memory_space<vmem>>, vector<96x32xbf16>
    %c0_44 = arith.constant 0 : index
    %c0_45 = arith.constant 0 : index
    %100 = vector.load %arg14[%c0_44, %c0_45] : memref<96x1xf32, #tpu.memory_space<vmem>>, vector<96x1xf32>
    %c0_46 = arith.constant 0 : index
    %c0_47 = arith.constant 0 : index
    %101 = vector.load %arg15[%c0_46, %c0_47] : memref<32x32xbf16, #tpu.memory_space<vmem>>, vector<32x32xbf16>
    %c0_48 = arith.constant 0 : index
    %c0_49 = arith.constant 0 : index
    %102 = vector.load %arg16[%c0_48, %c0_49] : memref<1x32xf32, #tpu.memory_space<vmem>>, vector<1x32xf32>
    %c0_50 = arith.constant 0 : index
    %c0_51 = arith.constant 0 : index
    %103 = vector.load %arg17[%c0_50, %c0_51] : memref<1x32xf32, #tpu.memory_space<vmem>>, vector<1x32xf32>
    %c0_52 = arith.constant 0 : index
    %c0_53 = arith.constant 0 : index
    %104 = vector.load %arg18[%c0_52, %c0_53] : memref<1x32xf32, #tpu.memory_space<vmem>>, vector<1x32xf32>
    %105 = arith.truncf %97 : vector<8x32xf32> to vector<8x32xbf16>
    %106 = arith.truncf %98 : vector<16x32xf32> to vector<16x32xbf16>
    %107 = arith.truncf %3 : vector<16x32xf32> to vector<16x32xbf16>
    %108 = vector.extract_strided_slice %99 {offsets = [0, 0], sizes = [32, 32], strides = [1, 1]} : vector<96x32xbf16> to vector<32x32xbf16>
    %109 = vector.extract_strided_slice %100 {offsets = [0, 0], sizes = [32, 1], strides = [1, 1]} : vector<96x1xf32> to vector<32x1xf32>
    %cst_54 = arith.constant dense<0.000000e+00> : vector<32x8xf32>
    %110 = tpu.matmul %108, %105, %cst_54 {dimension_numbers = #tpu.dot_dimension_numbers<[1], [1], [0], [0], [0, 0, 1, 0], [], []>} : vector<32x32xbf16>, vector<8x32xbf16>, vector<32x8xf32> -> vector<32x8xf32>
    %111 = vector.broadcast %109 : vector<32x1xf32> to vector<32x8xf32>
    %112 = arith.addf %110, %111 : vector<32x8xf32>
    %cst_55 = arith.constant 0.353553385 : f32
    %113 = vector.broadcast %cst_55 : f32 to vector<32x8xf32>
    %114 = arith.mulf %112, %113 : vector<32x8xf32>
    %115 = vector.extract_strided_slice %99 {offsets = [32, 0], sizes = [32, 32], strides = [1, 1]} : vector<96x32xbf16> to vector<32x32xbf16>
    %116 = vector.extract_strided_slice %100 {offsets = [32, 0], sizes = [32, 1], strides = [1, 1]} : vector<96x1xf32> to vector<32x1xf32>
    %cst_56 = arith.constant dense<0.000000e+00> : vector<32x16xf32>
    %117 = tpu.matmul %115, %106, %cst_56 {dimension_numbers = #tpu.dot_dimension_numbers<[1], [1], [0], [0], [0, 0, 1, 0], [], []>} : vector<32x32xbf16>, vector<16x32xbf16>, vector<32x16xf32> -> vector<32x16xf32>
    %118 = vector.broadcast %116 : vector<32x1xf32> to vector<32x16xf32>
    %119 = arith.addf %117, %118 : vector<32x16xf32>
    %120 = vector.extract_strided_slice %99 {offsets = [64, 0], sizes = [32, 32], strides = [1, 1]} : vector<96x32xbf16> to vector<32x32xbf16>
    %121 = vector.extract_strided_slice %100 {offsets = [64, 0], sizes = [32, 1], strides = [1, 1]} : vector<96x1xf32> to vector<32x1xf32>
    %cst_57 = arith.constant dense<0.000000e+00> : vector<32x16xf32>
    %122 = tpu.matmul %120, %107, %cst_57 {dimension_numbers = #tpu.dot_dimension_numbers<[1], [1], [0], [0], [0, 0, 1, 0], [], []>} : vector<32x32xbf16>, vector<16x32xbf16>, vector<32x16xf32> -> vector<32x16xf32>
    %123 = vector.broadcast %121 : vector<32x1xf32> to vector<32x16xf32>
    %124 = arith.addf %122, %123 : vector<32x16xf32>
    %125 = vector.shape_cast %114 : vector<32x8xf32> to vector<4x8x8xf32>
    %126 = arith.truncf %125 : vector<4x8x8xf32> to vector<4x8x8xbf16>
    %127 = vector.shape_cast %119 : vector<32x16xf32> to vector<4x8x16xf32>
    %128 = arith.truncf %127 : vector<4x8x16xf32> to vector<4x8x16xbf16>
    %129 = vector.shape_cast %124 : vector<32x16xf32> to vector<4x8x16xf32>
    %130 = arith.truncf %129 : vector<4x8x16xf32> to vector<4x8x16xbf16>
    %cst_58 = arith.constant dense<0.000000e+00> : vector<4x8x16xf32>
    %131 = tpu.matmul %126, %128, %cst_58 {dimension_numbers = #tpu.dot_dimension_numbers<[1], [1], [2], [2], [0, 0, 0, 2, 1, 2], [0], [0]>} : vector<4x8x8xbf16>, vector<4x8x16xbf16>, vector<4x8x16xf32> -> vector<4x8x16xf32>
    %cst_59 = arith.constant dense<0xFF800000> : vector<4x8xf32>
    %132 = vector.multi_reduction <maximumf>, %131, %cst_59 [2] : vector<4x8x16xf32> to vector<4x8xf32>
    %133 = vector.shape_cast %132 : vector<4x8xf32> to vector<4x8x1xf32>
    %134 = vector.broadcast %133 : vector<4x8x1xf32> to vector<4x8x16xf32>
    %135 = arith.subf %131, %134 : vector<4x8x16xf32>
    %136 = math.exp %135 : vector<4x8x16xf32>
    %cst_60 = arith.constant dense<0.000000e+00> : vector<4x8xf32>
    %137 = vector.multi_reduction <add>, %136, %cst_60 [2] : vector<4x8x16xf32> to vector<4x8xf32>
    %138 = vector.shape_cast %137 : vector<4x8xf32> to vector<4x8x1xf32>
    %139 = tpu.reciprocal %138 {approx = true} : vector<4x8x1xf32> -> vector<4x8x1xf32>
    %140 = vector.broadcast %139 : vector<4x8x1xf32> to vector<4x8x16xf32>
    %141 = arith.mulf %136, %140 : vector<4x8x16xf32>
    %142 = arith.truncf %141 : vector<4x8x16xf32> to vector<4x8x16xbf16>
    %cst_61 = arith.constant dense<0.000000e+00> : vector<4x8x8xf32>
    %143 = tpu.matmul %142, %130, %cst_61 {dimension_numbers = #tpu.dot_dimension_numbers<[2], [2], [1], [1], [0, 0, 0, 1, 1, 1], [0], [0]>} : vector<4x8x16xbf16>, vector<4x8x16xbf16>, vector<4x8x8xf32> -> vector<4x8x8xf32>
    %144 = vector.extract_strided_slice %143 {offsets = [0, 0, 0], sizes = [1, 8, 8], strides = [1, 1, 1]} : vector<4x8x8xf32> to vector<1x8x8xf32>
    %145 = vector.shape_cast %144 : vector<1x8x8xf32> to vector<8x8xf32>
    %146 = vector.extract_strided_slice %143 {offsets = [1, 0, 0], sizes = [1, 8, 8], strides = [1, 1, 1]} : vector<4x8x8xf32> to vector<1x8x8xf32>
    %147 = vector.shape_cast %146 : vector<1x8x8xf32> to vector<8x8xf32>
    %148 = vector.extract_strided_slice %143 {offsets = [2, 0, 0], sizes = [1, 8, 8], strides = [1, 1, 1]} : vector<4x8x8xf32> to vector<1x8x8xf32>
    %149 = vector.shape_cast %148 : vector<1x8x8xf32> to vector<8x8xf32>
    %150 = vector.extract_strided_slice %143 {offsets = [3, 0, 0], sizes = [1, 8, 8], strides = [1, 1, 1]} : vector<4x8x8xf32> to vector<1x8x8xf32>
    %151 = vector.shape_cast %150 : vector<1x8x8xf32> to vector<8x8xf32>
    %152 = tpu.concatenate %145, %147, %149, %151 in 1 : vector<8x8xf32>, vector<8x8xf32>, vector<8x8xf32>, vector<8x8xf32> -> vector<8x32xf32>
    %153 = arith.truncf %152 : vector<8x32xf32> to vector<8x32xbf16>
    %cst_62 = arith.constant dense<0.000000e+00> : vector<8x32xf32>
    %154 = tpu.matmul %153, %101, %cst_62 {dimension_numbers = #tpu.dot_dimension_numbers<[1], [1], [0], [0], [0, 0, 1, 0], [], []>} : vector<8x32xbf16>, vector<32x32xbf16>, vector<8x32xf32> -> vector<8x32xf32>
    %155 = vector.broadcast %102 : vector<1x32xf32> to vector<8x32xf32>
    %156 = arith.addf %154, %155 : vector<8x32xf32>
    %157 = arith.addf %156, %96 : vector<8x32xf32>
    %cst_63 = arith.constant dense<0.000000e+00> : vector<8xf32>
    %158 = vector.multi_reduction <add>, %157, %cst_63 [1] : vector<8x32xf32> to vector<8xf32>
    %159 = vector.shape_cast %158 : vector<8xf32> to vector<8x1xf32>
    %cst_64 = arith.constant 3.200000e+01 : f32
    %160 = vector.broadcast %cst_64 : f32 to vector<8x1xf32>
    %161 = arith.divf %159, %160 : vector<8x1xf32>
    %162 = vector.broadcast %161 : vector<8x1xf32> to vector<8x32xf32>
    %163 = arith.subf %157, %162 : vector<8x32xf32>
    %164 = arith.mulf %163, %163 : vector<8x32xf32>
    %cst_65 = arith.constant dense<0.000000e+00> : vector<8xf32>
    %165 = vector.multi_reduction <add>, %164, %cst_65 [1] : vector<8x32xf32> to vector<8xf32>
    %166 = vector.shape_cast %165 : vector<8xf32> to vector<8x1xf32>
    %cst_66 = arith.constant 3.200000e+01 : f32
    %167 = vector.broadcast %cst_66 : f32 to vector<8x1xf32>
    %168 = arith.divf %166, %167 : vector<8x1xf32>
    %169 = vector.broadcast %161 : vector<8x1xf32> to vector<8x32xf32>
    %170 = arith.subf %157, %169 : vector<8x32xf32>
    %cst_67 = arith.constant 9.99999974E-6 : f32
    %171 = vector.broadcast %cst_67 : f32 to vector<8x1xf32>
    %172 = arith.addf %168, %171 : vector<8x1xf32>
    %173 = math.rsqrt %172 : vector<8x1xf32>
    %174 = vector.broadcast %173 : vector<8x1xf32> to vector<8x32xf32>
    %175 = arith.mulf %170, %174 : vector<8x32xf32>
    %176 = vector.broadcast %103 : vector<1x32xf32> to vector<8x32xf32>
    %177 = arith.mulf %175, %176 : vector<8x32xf32>
    %178 = vector.broadcast %104 : vector<1x32xf32> to vector<8x32xf32>
    %179 = arith.addf %177, %178 : vector<8x32xf32>
    %c0_68 = arith.constant 0 : index
    %c0_69 = arith.constant 0 : index
    %180 = vector.load %arg19[%c0_68, %c0_69] : memref<64x32xbf16, #tpu.memory_space<vmem>>, vector<64x32xbf16>
    %c0_70 = arith.constant 0 : index
    %c0_71 = arith.constant 0 : index
    %181 = vector.load %arg20[%c0_70, %c0_71] : memref<1x64xf32, #tpu.memory_space<vmem>>, vector<1x64xf32>
    %c0_72 = arith.constant 0 : index
    %c0_73 = arith.constant 0 : index
    %182 = vector.load %arg21[%c0_72, %c0_73] : memref<32x64xbf16, #tpu.memory_space<vmem>>, vector<32x64xbf16>
    %c0_74 = arith.constant 0 : index
    %c0_75 = arith.constant 0 : index
    %183 = vector.load %arg22[%c0_74, %c0_75] : memref<1x32xf32, #tpu.memory_space<vmem>>, vector<1x32xf32>
    %c0_76 = arith.constant 0 : index
    %c0_77 = arith.constant 0 : index
    %184 = vector.load %arg23[%c0_76, %c0_77] : memref<1x32xf32, #tpu.memory_space<vmem>>, vector<1x32xf32>
    %c0_78 = arith.constant 0 : index
    %c0_79 = arith.constant 0 : index
    %185 = vector.load %arg24[%c0_78, %c0_79] : memref<1x32xf32, #tpu.memory_space<vmem>>, vector<1x32xf32>
    %186 = arith.truncf %179 : vector<8x32xf32> to vector<8x32xbf16>
    %cst_80 = arith.constant dense<0.000000e+00> : vector<8x64xf32>
    %187 = tpu.matmul %186, %180, %cst_80 {dimension_numbers = #tpu.dot_dimension_numbers<[1], [1], [0], [0], [0, 0, 1, 0], [], []>} : vector<8x32xbf16>, vector<64x32xbf16>, vector<8x64xf32> -> vector<8x64xf32>
    %188 = vector.broadcast %181 : vector<1x64xf32> to vector<8x64xf32>
    %189 = arith.addf %187, %188 : vector<8x64xf32>
    %cst_81 = arith.constant 0.000000e+00 : f32
    %190 = vector.broadcast %cst_81 : f32 to vector<8x64xf32>
    %191 = arith.maximumf %189, %190 : vector<8x64xf32>
    %192 = arith.truncf %191 : vector<8x64xf32> to vector<8x64xbf16>
    %cst_82 = arith.constant dense<0.000000e+00> : vector<8x32xf32>
    %193 = tpu.matmul %192, %182, %cst_82 {dimension_numbers = #tpu.dot_dimension_numbers<[1], [1], [0], [0], [0, 0, 1, 0], [], []>} : vector<8x64xbf16>, vector<32x64xbf16>, vector<8x32xf32> -> vector<8x32xf32>
    %194 = vector.broadcast %183 : vector<1x32xf32> to vector<8x32xf32>
    %195 = arith.addf %193, %194 : vector<8x32xf32>
    %196 = arith.addf %195, %179 : vector<8x32xf32>
    %cst_83 = arith.constant dense<0.000000e+00> : vector<8xf32>
    %197 = vector.multi_reduction <add>, %196, %cst_83 [1] : vector<8x32xf32> to vector<8xf32>
    %198 = vector.shape_cast %197 : vector<8xf32> to vector<8x1xf32>
    %cst_84 = arith.constant 3.200000e+01 : f32
    %199 = vector.broadcast %cst_84 : f32 to vector<8x1xf32>
    %200 = arith.divf %198, %199 : vector<8x1xf32>
    %201 = vector.broadcast %200 : vector<8x1xf32> to vector<8x32xf32>
    %202 = arith.subf %196, %201 : vector<8x32xf32>
    %203 = arith.mulf %202, %202 : vector<8x32xf32>
    %cst_85 = arith.constant dense<0.000000e+00> : vector<8xf32>
    %204 = vector.multi_reduction <add>, %203, %cst_85 [1] : vector<8x32xf32> to vector<8xf32>
    %205 = vector.shape_cast %204 : vector<8xf32> to vector<8x1xf32>
    %cst_86 = arith.constant 3.200000e+01 : f32
    %206 = vector.broadcast %cst_86 : f32 to vector<8x1xf32>
    %207 = arith.divf %205, %206 : vector<8x1xf32>
    %208 = vector.broadcast %200 : vector<8x1xf32> to vector<8x32xf32>
    %209 = arith.subf %196, %208 : vector<8x32xf32>
    %cst_87 = arith.constant 9.99999974E-6 : f32
    %210 = vector.broadcast %cst_87 : f32 to vector<8x1xf32>
    %211 = arith.addf %207, %210 : vector<8x1xf32>
    %212 = math.rsqrt %211 : vector<8x1xf32>
    %213 = vector.broadcast %212 : vector<8x1xf32> to vector<8x32xf32>
    %214 = arith.mulf %209, %213 : vector<8x32xf32>
    %215 = vector.broadcast %184 : vector<1x32xf32> to vector<8x32xf32>
    %216 = arith.mulf %214, %215 : vector<8x32xf32>
    %217 = vector.broadcast %185 : vector<1x32xf32> to vector<8x32xf32>
    %218 = arith.addf %216, %217 : vector<8x32xf32>
    %c0_88 = arith.constant 0 : index
    %c0_89 = arith.constant 0 : index
    %c0_90 = arith.constant 0 : index
    %219 = vector.load %arg25[%c0_88, %c0_89, %c0_90] : memref<1x8x32xf32, #tpu.memory_space<vmem>>, vector<1x8x32xf32>
    %220 = vector.shape_cast %219 : vector<1x8x32xf32> to vector<8x32xf32>
    %221 = vector.shape_cast %218 : vector<8x32xf32> to vector<1x8x32xf32>
    tpu.vector_store %arg25[%c0_88, %c0_89, %c0_90], %221 {strides = array<i32>} : memref<1x8x32xf32, #tpu.memory_space<vmem>>, vector<1x8x32xf32>,
    return
  }
  func.func @transform_0(%arg0: i32) -> (i32, i32, i32) {
    %c0_i32 = arith.constant 0 : i32
    %c0_i32_0 = arith.constant 0 : i32
    %c0_i32_1 = arith.constant 0 : i32
    return %arg0, %c0_i32, %c0_i32_0 : i32, i32, i32
  }
  func.func @transform_1(%arg0: i32) -> (i32, i32, i32) {
    %c0_i32 = arith.constant 0 : i32
    %c0_i32_0 = arith.constant 0 : i32
    %c0_i32_1 = arith.constant 0 : i32
    return %arg0, %c0_i32, %c0_i32_0 : i32, i32, i32
  }
  func.func @transform_2(%arg0: i32) -> (i32, i32, i32) {
    %c0_i32 = arith.constant 0 : i32
    %c0_i32_0 = arith.constant 0 : i32
    %c0_i32_1 = arith.constant 0 : i32
    return %arg0, %c0_i32, %c0_i32_0 : i32, i32, i32
  }
  func.func @transform_3(%arg0: i32) -> (i32, i32, i32) {
    %c0_i32 = arith.constant 0 : i32
    %c0_i32_0 = arith.constant 0 : i32
    %c0_i32_1 = arith.constant 0 : i32
    return %arg0, %c0_i32, %c0_i32_0 : i32, i32, i32
  }
  func.func @transform_4(%arg0: i32) -> (i32, i32, i32) {
    %c0_i32 = arith.constant 0 : i32
    %c0_i32_0 = arith.constant 0 : i32
    %c0_i32_1 = arith.constant 0 : i32
    return %arg0, %c0_i32, %c0_i32_0 : i32, i32, i32
  }
  func.func @transform_5(%arg0: i32) -> (i32, i32, i32) {
    %c0_i32 = arith.constant 0 : i32
    %c0_i32_0 = arith.constant 0 : i32
    %c0_i32_1 = arith.constant 0 : i32
    return %arg0, %c0_i32, %c0_i32_0 : i32, i32, i32
  }
  func.func @transform_6(%arg0: i32) -> (i32, i32) {
    %c0_i32 = arith.constant 0 : i32
    %c0_i32_0 = arith.constant 0 : i32
    %c0_i32_1 = arith.constant 0 : i32
    return %c0_i32, %c0_i32_0 : i32, i32
  }
  func.func @transform_7(%arg0: i32) -> (i32, i32) {
    %c0_i32 = arith.constant 0 : i32
    %c0_i32_0 = arith.constant 0 : i32
    %c0_i32_1 = arith.constant 0 : i32
    return %c0_i32, %c0_i32_0 : i32, i32
  }
  func.func @transform_8(%arg0: i32) -> (i32, i32) {
    %c0_i32 = arith.constant 0 : i32
    %c0_i32_0 = arith.constant 0 : i32
    %c0_i32_1 = arith.constant 0 : i32
    return %c0_i32, %c0_i32_0 : i32, i32
  }
  func.func @transform_9(%arg0: i32) -> (i32, i32) {
    %c0_i32 = arith.constant 0 : i32
    %c0_i32_0 = arith.constant 0 : i32
    %c0_i32_1 = arith.constant 0 : i32
    return %c0_i32, %c0_i32_0 : i32, i32
  }
  func.func @transform_10(%arg0: i32) -> (i32, i32) {
    %c0_i32 = arith.constant 0 : i32
    %c0_i32_0 = arith.constant 0 : i32
    %c0_i32_1 = arith.constant 0 : i32
    return %c0_i32, %c0_i32_0 : i32, i32
  }
  func.func @transform_11(%arg0: i32) -> (i32, i32) {
    %c0_i32 = arith.constant 0 : i32
    %c0_i32_0 = arith.constant 0 : i32
    %c0_i32_1 = arith.constant 0 : i32
    return %c0_i32, %c0_i32_0 : i32, i32
  }
  func.func @transform_12(%arg0: i32) -> (i32, i32) {
    %c0_i32 = arith.constant 0 : i32
    %c0_i32_0 = arith.constant 0 : i32
    %c0_i32_1 = arith.constant 0 : i32
    return %c0_i32, %c0_i32_0 : i32, i32
  }
  func.func @transform_13(%arg0: i32) -> (i32, i32) {
    %c0_i32 = arith.constant 0 : i32
    %c0_i32_0 = arith.constant 0 : i32
    %c0_i32_1 = arith.constant 0 : i32
    return %c0_i32, %c0_i32_0 : i32, i32
  }
  func.func @transform_14(%arg0: i32) -> (i32, i32) {
    %c0_i32 = arith.constant 0 : i32
    %c0_i32_0 = arith.constant 0 : i32
    %c0_i32_1 = arith.constant 0 : i32
    return %c0_i32, %c0_i32_0 : i32, i32
  }
  func.func @transform_15(%arg0: i32) -> (i32, i32) {
    %c0_i32 = arith.constant 0 : i32
    %c0_i32_0 = arith.constant 0 : i32
    %c0_i32_1 = arith.constant 0 : i32
    return %c0_i32, %c0_i32_0 : i32, i32
  }
  func.func @transform_16(%arg0: i32) -> (i32, i32) {
    %c0_i32 = arith.constant 0 : i32
    %c0_i32_0 = arith.constant 0 : i32
    %c0_i32_1 = arith.constant 0 : i32
    return %c0_i32, %c0_i32_0 : i32, i32
  }
  func.func @transform_17(%arg0: i32) -> (i32, i32) {
    %c0_i32 = arith.constant 0 : i32
    %c0_i32_0 = arith.constant 0 : i32
    %c0_i32_1 = arith.constant 0 : i32
    return %c0_i32, %c0_i32_0 : i32, i32
  }
  func.func @transform_18(%arg0: i32) -> (i32, i32) {
    %c0_i32 = arith.constant 0 : i32
    %c0_i32_0 = arith.constant 0 : i32
    %c0_i32_1 = arith.constant 0 : i32
    return %c0_i32, %c0_i32_0 : i32, i32
  }
  func.func @transform_19(%arg0: i32) -> (i32, i32) {
    %c0_i32 = arith.constant 0 : i32
    %c0_i32_0 = arith.constant 0 : i32
    %c0_i32_1 = arith.constant 0 : i32
    return %c0_i32, %c0_i32_0 : i32, i32
  }
  func.func @transform_20(%arg0: i32) -> (i32, i32) {
    %c0_i32 = arith.constant 0 : i32
    %c0_i32_0 = arith.constant 0 : i32
    %c0_i32_1 = arith.constant 0 : i32
    return %c0_i32, %c0_i32_0 : i32, i32
  }
  func.func @transform_21(%arg0: i32) -> (i32, i32) {
    %c0_i32 = arith.constant 0 : i32
    %c0_i32_0 = arith.constant 0 : i32
    %c0_i32_1 = arith.constant 0 : i32
    return %c0_i32, %c0_i32_0 : i32, i32
  }
  func.func @transform_22(%arg0: i32) -> (i32, i32) {
    %c0_i32 = arith.constant 0 : i32
    %c0_i32_0 = arith.constant 0 : i32
    %c0_i32_1 = arith.constant 0 : i32
    return %c0_i32, %c0_i32_0 : i32, i32
  }
  func.func @transform_23(%arg0: i32) -> (i32, i32) {
    %c0_i32 = arith.constant 0 : i32
    %c0_i32_0 = arith.constant 0 : i32
    %c0_i32_1 = arith.constant 0 : i32
    return %c0_i32, %c0_i32_0 : i32, i32
  }
  func.func @transform_24(%arg0: i32) -> (i32, i32, i32) {
    %c0_i32 = arith.constant 0 : i32
    %c0_i32_0 = arith.constant 0 : i32
    %c0_i32_1 = arith.constant 0 : i32
    return %arg0, %c0_i32, %c0_i32_0 : i32, i32, i32
  }
}

</mosaic_0001>

<bundles_post_ra>
// kernel: tpu_custom_call.1
= control target key start
LH: loop header
LB: loop body
LE: loop exit
PB: predicated region body
PF: predicated region fallthrough
CT: control target
= control target key end

     0   :  { %s4099_s0 = inlined_call_operand.vmem [shape: f32[2,8,32], index: 0, kind: input, shape index: {}]   ;;  %s4100_s1 = inlined_call_operand.vmem [shape: f32[2,16,32], index: 1, kind: input, shape index: {}]   ;;  %s4101_s2 = inlined_call_operand.vmem [shape: f32[2,8,32], index: 2, kind: input, shape index: {}]   ;;  %s4102_s3 = inlined_call_operand.vmem [shape: f32[2,16,32], index: 3, kind: input, shape index: {}]   ;;  %s4103_s4 = inlined_call_operand.vmem [shape: f32[2,4,32], index: 4, kind: input, shape index: {}]   ;;  %s4104_s5 = inlined_call_operand.vmem [shape: f32[2,4,32], index: 5, kind: input, shape index: {}]   ;;  %s4105_s6 = inlined_call_operand.vmem [shape: bf16[96,32], index: 6, kind: input, shape index: {}]   ;;  %s4106_s7 = inlined_call_operand.vmem [shape: f32[96,1], index: 7, kind: input, shape index: {}]   ;;  %s4107_s8 = inlined_call_operand.vmem [shape: bf16[32,32], index: 8, kind: input, shape index: {}]   ;;  %s4108_s9 = inlined_call_operand.vmem [shape: f32[1,32], index: 9, kind: input, shape index: {}]   ;;  %s4109_s10 = inlined_call_operand.vmem [shape: f32[1,32], index: 10, kind: input, shape index: {}]   ;;  %s4110_s11 = inlined_call_operand.vmem [shape: f32[1,32], index: 11, kind: input, shape index: {}]   ;;  %s4111_s12 = inlined_call_operand.vmem [shape: bf16[96,32], index: 12, kind: input, shape index: {}]   ;;  %s4112_s13 = inlined_call_operand.vmem [shape: f32[96,1], index: 13, kind: input, shape index: {}]   ;;  %s4113_s14 = inlined_call_operand.vmem [shape: bf16[32,32], index: 14, kind: input, shape index: {}]   ;;  %s4114_s15 = inlined_call_operand.vmem [shape: f32[1,32], index: 15, kind: input, shape index: {}]   ;;  %s4115_s16 = inlined_call_operand.vmem [shape: f32[1,32], index: 16, kind: input, shape index: {}]   ;;  %s4116_s17 = inlined_call_operand.vmem [shape: f32[1,32], index: 17, kind: input, shape index: {}]   ;;  %s4117_s18 = inlined_call_operand.vmem [shape: bf16[64,32], index: 18, kind: input, shape index: {}]   ;;  %s4118_s19 = inlined_call_operand.vmem [shape: f32[1,64], index: 19, kind: input, shape index: {}]   ;;  %s4119_s20 = inlined_call_operand.vmem [shape: bf16[32,64], index: 20, kind: input, shape index: {}]   ;;  %s4120_s21 = inlined_call_operand.vmem [shape: f32[1,32], index: 21, kind: input, shape index: {}]   ;;  %s4121_s22 = inlined_call_operand.vmem [shape: f32[1,32], index: 22, kind: input, shape index: {}]   ;;  %s4122_s23 = inlined_call_operand.vmem [shape: f32[1,32], index: 23, kind: input, shape index: {}]   ;;  %s4123_s24 = inlined_call_operand.hbm [shape: f32[2,8,32], index: 24, kind: output, shape index: {}]  }
   0x1   :  { %4138 = sst [smem:[#allocation14_spill]] %s4099_s0 }
   0x2   :  { %4139 = sst [smem:[#allocation15_spill]] %s4100_s1 }
   0x3   :  { %4140 = sst [smem:[#allocation16_spill]] %s4101_s2 }
   0x4   :  { %4141 = sst [smem:[#allocation17_spill]] %s4102_s3 }
   0x5   :  { %4142 = sst [smem:[#allocation18_spill]] %s4103_s4 }
   0x6   :  { %4143 = sst [smem:[#allocation19_spill]] %s4104_s5 }
   0x7   :  { %4144 = sst [smem:[#allocation20_spill]] %s4105_s6 }
   0x8   :  { %4145 = sst [smem:[#allocation21_spill]] %s4106_s7 }
   0x9   :  { %4146 = sst [smem:[#allocation22_spill]] %s4107_s8 }
   0xa   :  { %4147 = sst [smem:[#allocation23_spill]] %s4116_s17 }
   0xb   :  { %4148 = sst [smem:[#allocation24_spill]] %s4118_s19 }
   0xc   :  { %4149 = sst [smem:[#allocation25_spill]] %s4120_s21 }
   0xd   :  { %4150 = sst [smem:[#allocation26_spill]] %s4121_s22 }
   0xe   :  { %4151 = sst [smem:[#allocation27_spill]] %s4122_s23 }
   0xf   :  { %4152 = sst [smem:[#allocation28_spill]] %s4123_s24 }
  0x10   :  { %29 = vsyncpa [#allocation3], 0 }
  0x11   :  { %31 = vsyncpa [#allocation3 + $0x1], 0  ;;  %s3603_s5 = smov 0   ;;  %s3605_s26 = smov 0  }
  0x12   :  { %s3607_s27 = smov 0   ;;  %s3609_s28 = smov 0  }
  0x13 LB: > { %4153 = sst [smem:[#allocation5_spill]] %s3457_s5  ;;  %s3624_s6 = sadd.s32 4294967295, %s3469_s28   ;;  %s3469_s28 = sphi %s3609_s28, %s4185_s28   ;;  %s3465_s27 = sphi %s3607_s27, %s4188_s27   ;;  %s3461_s26 = sphi %s3605_s26, %s4187_s26   ;;  %s3457_s5 = sphi %s3603_s5, %s4186_s5  }
  0x14   : > { %4154 = sst [smem:[#allocation6_spill]] %s3461_s26  ;;  %s2979_s2 = sadd.s32 4294967294, %s3469_s28  }
  0x15   : > { %4155 = sst [smem:[#allocation7_spill]] %s3465_s27  ;;  %s3628_s29 = sadd.s32 1, %s3469_s28  }
  0x16   : > { %4156 = sst [smem:[#allocation8_spill]] %s3469_s28  ;;  %s578_s0 = sadd.s32 1, %s3465_s27 }
  0x17   : > { %4157 = sst [smem:[#allocation9_spill]] %s3624_s6  ;;  %s575_s7 = ssub.s32 %s3469_s28, %s3628_s29 }
  0x18   : > { %4158 = sst [smem:[#allocation10_spill]] %s3628_s29  ;;  %p588_p0 = scmp.ne.s32.totalorder %s3465_s27, %s3461_s26 }
  0x19   : > { %p576_p1 = scmp.eq.s32.totalorder %s575_s7, 0  ;;  %p589_p2 = scmp.eq.s32.totalorder %s3624_s6, 1 }
  0x1a   : > { %p594_p3 = scmp.ne.s32.totalorder %s3461_s26, %s3457_s5  ;;  %p595_p4 = scmp.eq.s32.totalorder %s2979_s2, 1 }
  0x1b   : > { %s3639_s30 = scalar_select %p576_p1, %s3465_s27, %s578_s0  }
  0x1c   : > { %p3641_p5 = por %p589_p2, %p588_p0  ;;  %p3645_p6 = por %p595_p4, %p594_p3 }
  0x1d   : > { %4159 = sst [smem:[#allocation11_spill]] %s3639_s30  ;;  %p2982_p7 = scmp.ge.s32.totalorder %s3469_s28, 1 }
  0x1e   : > { %s4160_s3 = scalar_select %p3641_p5, 1, 0 }
  0x1f   : > { %s4162_s25 = scalar_select %p3645_p6, 1, 0 }
  0x20   : > { %4161 = sst [smem:[#allocation12_spill]] %s4160_s3  ;;  %p711_p8 = scmp.lt.s32.totalorder %s3469_s28, 3 }
  0x21   : > { %4163 = sst [smem:[#allocation13_spill]] %s4162_s25 }
  0x22   : > { %p712_p9 = pnand %p2982_p7, %p711_p8 }
  0x23   : > { %p798_p10 = scmp.lt.s32.totalorder (!%p712_p9), %s3624_s6, 1  ;;  %vm899_vm0 = vcmask (!%p712_p9), 261120   ;;  %s4164_s1 = sld [smem:[#allocation20_spill]] (!%p712_p9)  ;;  %v3471_v2 = vmov (!%p712_p9), 0   ;;  %v3472_v25 = vmov (!%p712_p9), 0.0   ;;  %vm3473_vm1 = vmmov (!%p712_p9), 0  }
  0x24   : > { %715 = sbr.rel (%p712_p9) target bundleno = 4290 (0x10c2), region = 116  ;;  %3345 = vset.pattern.permute.xlu0 (!%p712_p9), %v3471_v2  ;;  %3346 = vset.pattern.permute.xlu1 (!%p712_p9), %v3471_v2  ;;  %s4165_s4 = sld [smem:[#allocation21_spill]] (!%p712_p9)  ;;  %vm1170_vm2 = vcmask (!%p712_p9), 1043456   ;;  %vm1166_vm3 = vcmask (!%p712_p9), 64512   ;;  %vm1400_vm4 = vcmask (!%p712_p9), 97280   ;;  %vm1646_vm5 = vcmask (!%p712_p9), 130048  }
  0x25   : > { %s4166_s28 = sld [smem:[#allocation14_spill]] (!%p712_p9)  ;;  %s4167_s23 = sld [smem:[#allocation16_spill]] (!%p712_p9)  ;;  %vm1648_vm6 = vcmask (!%p712_p9), 195584   ;;  %vm2767_vm7 = vcmask (!%p712_p9), 523264  }
  0x26   : > { %s4168_s8 = sld [smem:[#allocation18_spill]] (!%p712_p9)  ;;  %s3475_s5 = smov (!%p712_p9), 8  }
  0x27   : > { %s4172_s29 = sld [smem:[#allocation17_spill]] (!%p712_p9)  ;;  %s4174_s3 = sld [smem:[#allocation24_spill]] (!%p712_p9) }
  0x28   : > { %s4176_s24 = sld [smem:[#allocation6_spill]] (!%p712_p9)  ;;  %s4179_s19 = sld [smem:[#allocation26_spill]] (!%p712_p9) }
  0x29   : > { %v3347_v0 = vld [vmem:[%s4164_s1] sm:$0xff] (!%p712_p9)   ;;  %v3348_v1 = vld [vmem:[%s4164_s1 + $0x10] sm:$0xff] (!%p712_p9)   ;;  %v3349_v21 = vld [vmem:[%s4164_s1 + $0x8] sm:$0xff] (!%p712_p9)  }
  0x2a   : > { %3128 = vmatprep.mubr.msk.bf16.mxu0 (!%p712_p9), %vm899_vm0, %v3347_v0  ;;  %3134 = vmatprep.mubr.msk.bf16.mxu1 (!%p712_p9), %vm899_vm0, %v3348_v1  ;;  %v847_v3 = vld [vmem:[%s4165_s4] sm:$0xff] (!%p712_p9)  ;;  %v849_v4 = vld [vmem:[%s4165_s4 + $0x10] sm:$0xff] (!%p712_p9)  ;;  %v848_v7 = vld [vmem:[%s4165_s4 + $0x8] sm:$0xff] (!%p712_p9) }
  0x2b   : > { %s3656_s2 = scalar_select %p798_p10, %s3624_s6, 1  ;;  %871 = vperm.xlu0 %3345, %v847_v3   ;;  %881 = vperm.xlu1 %3346, %v849_v4   ;;  %v850_v11 = vld [vmem:[%s4165_s4 + $0x18] sm:$0xff]  ;;  %v851_v13 = vld [vmem:[%s4165_s4 + $0x20] sm:$0xff]  ;;  %v852_v18 = vld [vmem:[%s4165_s4 + $0x28] sm:$0xff] }
  0x2c   : > { %v853_v20 = vld [vmem:[%s4165_s4 + $0x30] sm:$0xff]  ;;  %v854_v22 = vld [vmem:[%s4165_s4 + $0x38] sm:$0xff]  ;;  %v3351_v26 = vld [vmem:[%s4164_s1 + $0x20] sm:$0xff]  }
  0x2d   : > { %s2984_s30 = sshll.u32 %s3656_s2, 3  ;;  %s2990_s27 = sshll.u32 %s3656_s2, 2  ;;  %v3350_v23 = vld [vmem:[%s4164_s1 + $0x18] sm:$0xff]   ;;  %v3352_v27 = vld [vmem:[%s4164_s1 + $0x28] sm:$0xff]  }
  0x2e   : > { %s801_s0 = scalar_lea.vmem %s4166_s28, %s2984_s30  ;;  %s810_s22 = scalar_lea.vmem %s4167_s23, %s2984_s30 }
  0x2f   : > { %v3677_v5 = vld [vmem:[%s801_s0] sm:$0xff]  ;;  %s819_s21 = scalar_lea.vmem %s4168_s8, %s2990_s27  ;;  %s4169_s28 = sld [smem:[#allocation19_spill]]  ;;  %876 = vperm.xlu0 %3345, %v848_v7   ;;  %886 = vperm.xlu1 %3346, %v850_v11  }
  0x30   : > { %v3679_v6 = vld [vmem:[%s810_s22] sm:$0xff]  ;;  %s4170_s0 = sld [smem:[#allocation22_spill]]  ;;  %s3474_s8 = smov 16  }
  0x31   : > { %v833_v8 = vadd.f32 %v3679_v6, %v3677_v5  ;;  %v831_v9 = vld [vmem:[%s819_s21] sm:$0xf]  ;;  %s3060_s17 = sshll.u32 %s3656_s2, 4  ;;  %s4177_s22 = sld [smem:[#allocation9_spill]] }
  0x32   : > { %v868_v16 = vpack.c.bf16 %v831_v9, %v3677_v5  ;;  %s795_s23 = sand.u32 1, %s4176_s24  }
  0x33   : > { %v866_v14 = vpack.c.bf16 %v833_v8, %v833_v8  ;;  %964 = vperm.xlu0 %3345, %v851_v13   ;;  %969 = vperm.xlu1 %3346, %v852_v18   ;;  %s2983_s26 = sshll.u32 %s795_s23, 3  ;;  %s2847_s24 = scalar_lea.sflag [#allocation3], %s795_s23 }
  0x34   : > { %v1087_v24 = vsel %vm899_vm0, %v868_v16, 0 }
  0x35   : > { %s823_s25 = scalar_lea.vmem %s4169_s28, %s2990_s27  ;;  %3294 = vmatprep.subr.msk.bf16.mxu0 %vm899_vm0, %v866_v14  ;;  %v907_v17 = vsel %vm899_vm0, %v866_v14, 0  ;;  %s3476_s28 = smov 24  }
  0x36   : > { %v832_v10 = vld [vmem:[%s823_s25] sm:$0xf]  ;;  %3127 = vmatpush3.bf16.xpose.msra.mxu0 %v907_v17  ;;  %s4171_s27 = sld [smem:[#allocation15_spill]]  ;;  %s815_s25 = scalar_lea.vmem %s4172_s29, %s3060_s17 }
  0x37   : > { %v834_v12 = vadd.f32 %v832_v10, %v831_v9  ;;  %3296 = vmatprep.subr.msk.bf16.mxu0 %vm899_vm0, %v868_v16  ;;  %974 = vperm.xlu0 %3345, %v853_v20   ;;  %s4181_s29 = sld [smem:[#allocation28_spill]] }
  0x38   : > { %979 = vperm.xlu1 %3346, %v854_v22  }
  0x39   : > { %v867_v15 = vpack.c.bf16 %v834_v12, %v833_v8 }
  0x3b   : > { %3295 = vmatprep.subr.msk.bf16.mxu1 %vm899_vm0, %v867_v15  ;;  %v999_v19 = vsel %vm899_vm0, %v867_v15, 0 }
  0x3c   : > { %3133 = vmatpush3.bf16.xpose.msra.mxu1 %v999_v19  ;;  %s806_s30 = scalar_lea.vmem %s4171_s27, %s3060_s17  ;;  %s4173_s27 = sld [smem:[#allocation23_spill]] }
  0x3d   : > { %3129 = vmatmul.mubr.msk.bf16.vlgmr.msra.gmra.mrb[0].mxu0 %vm899_vm0, %v3349_v21  ;;  %3144 = vmatprep.subr.bf16.mxu1 %v3472_v25 }
  0x3e   : > { %3139 = vmatpush3.bf16.xpose.msra.mxu0 %v1087_v24  ;;  %3140 = vmatprep.mubr.msk.bf16.mxu0 %vm899_vm0, %v3351_v26 }
  0x3f   : > { %3150 = vmatprep.subr.bf16.mxu0 %v3472_v25 }
  0x43   : > { %3135 = vmatmul.mubr.msk.bf16.vlgmr.msra.gmra.mrb[0].mxu1 %vm899_vm0, %v3350_v23 }
  0x44   : > { %3146 = vmatprep.mubr.msk.bf16.mxu1 %vm3473_vm1, %v3472_v25 }
  0x45   : > { %3141 = vmatmul.mubr.msk.bf16.vlgmr.msra.gmra.mrb[4].mxu0 %vm899_vm0, %v3352_v27 }
  0x46   : > { %3152 = vmatprep.mubr.msk.bf16.mxu0 %vm3473_vm1, %v3472_v25 }
  0xaa   : > { %v872_v28 = vpop.permute.xlu0 %871  ;;  %v882_v29 = vpop.permute.xlu1 %881 }
  0xae   : > { %v877_v30 = vpop.permute.xlu0 %876  ;;  %v887_v31 = vpop.permute.xlu1 %886 }
  0xb2   : > { %v965_v32 = vpop.permute.xlu0 %964  ;;  %v970_v44 = vpop.permute.xlu1 %969 }
  0xb6   : > { %v975_v63 = vpop.permute.xlu0 %974 }
  0xb7   : > { %v980_v1 = vpop.permute.xlu1 %979 }
 0x110   : > { %v3130_v33 = vpop.f32.mrb[0].mxu0 }
 0x111   : > { %v943_v35 = vpop.f32.mrb[1].mxu0  ;;  %v952_v36 = vadd.f32 %v3130_v33, %v882_v29 }
 0x112   : > { %v944_v37 = vadd.f32 %v943_v35, %v872_v28  ;;  %v3131_v39 = vpop.f32.mrb[2].mxu0  ;;  %v855_v35 = vld [vmem:[%s4165_s4 + $0x40] sm:$0xff] }
 0x113   : > { %v946_v41 = vpop.f32.mrb[3].mxu0  ;;  %v960_v49 = vmul.f32 0.35355338, %v952_v36  ;;  %v955_v51 = vadd.f32 %v3131_v39, %v887_v31 }
 0x114   : > { %v958_v43 = vmul.f32 0.35355338, %v944_v37  ;;  %v947_v45 = vadd.f32 %v946_v41, %v877_v30 }
 0x115   : > { %v1140_v57 = vpack.c.bf16 %v960_v49, %v960_v49  ;;  %v961_v58 = vmul.f32 0.35355338, %v955_v51 }
 0x116   : > { %v3136_v34 = vpop.f32.mrb[0].mxu1  ;;  %v1138_v50 = vpack.c.bf16 %v958_v43, %v958_v43  ;;  %v959_v52 = vmul.f32 0.35355338, %v947_v45 }
 0x117   : > { %v1035_v38 = vpop.f32.mrb[1].mxu1  ;;  %v1141_v59 = vpack.c.bf16 %v961_v58, %v961_v58  ;;  %v1044_v2 = vadd.f32 %v3136_v34, %v975_v63  ;;  %v858_v63 = vld [vmem:[%s4165_s4 + $0x58] sm:$0xff] }
 0x118   : > { %v1036_v40 = vadd.f32 %v1035_v38, %v965_v32  ;;  %v3137_v42 = vpop.f32.mrb[2].mxu1  ;;  %v1139_v55 = vpack.c.bf16 %v959_v52, %v959_v52  ;;  %1150 = vxpose.xlu0.c.b16.start.end [1/1] (short) (narrow) %v1138_v50, 16  ;;  %v3740_v60 = vpop.f32.mrb[4].mxu0 }
 0x119   : > { %v1038_v46 = vpop.f32.mrb[3].mxu1  ;;  %v3742_v61 = vpop.f32.mrb[5].mxu0  ;;  %v1047_v3 = vadd.f32 %v3137_v42, %v980_v1  ;;  %v1144_v4 = vpack.c.bf16 %v1044_v2, %v1044_v2  ;;  %v856_v1 = vld [vmem:[%s4165_s4 + $0x48] sm:$0xff] }
 0x11a   : > { %v1142_v47 = vpack.c.bf16 %v1036_v40, %v1036_v40  ;;  %v1039_v48 = vadd.f32 %v1038_v46, %v970_v44  ;;  %1214 = vxpose.xlu1.c.b16.start.end [1/1] (short) (narrow) %v1139_v55, 16  ;;  %v3744_v62 = vpop.f32.mrb[6].mxu0 }
 0x11b   : > { %v3746_v0 = vpop.f32.mrb[7].mxu0  ;;  %v1145_v7 = vpack.c.bf16 %v1047_v3, %v1047_v3  ;;  %v1296_v9 = vsel %vm1170_vm2, %v1144_v4, 0 }
 0x11c   : > { %v1172_v53 = vsel %vm1170_vm2, %v1142_v47, 0  ;;  %v1143_v54 = vpack.c.bf16 %v1039_v48, %v1039_v48  ;;  %1276 = vxpose.xlu0.c.b16.start.end [1/1] (short) (narrow) %v1140_v57, 16 }
 0x11d   : > { %3145 = vmatpush3.bf16.msra.mxu1 %v1172_v53  ;;  %v1358_v11 = vsel %vm1170_vm2, %v1145_v7, 0 }
 0x11e   : > { %v1234_v56 = vsel %vm1170_vm2, %v1143_v54, 0  ;;  %3156 = vmatprep.subr.bf16.mxu1 %v3472_v25 }
 0x11f   : > { %3151 = vmatpush3.bf16.msra.mxu0 %v1234_v56 }
 0x120   : > { %3162 = vmatprep.subr.bf16.mxu0 %v3472_v25  ;;  %1338 = vxpose.xlu0.c.b16.start.end [1/1] (short) (narrow) %v1141_v59, 16 }
 0x17e   : > { %v1158_v8 = vpop.trf.xlu0 }
 0x17f   : > { %3147 = vmatmul.mubr.msk.bf16.vlgmr.msra.gmra.mrb[4].mxu1 %vm1166_vm3, %v1158_v8 }
 0x180   : > { %3157 = vmatpush3.bf16.msra.mxu1 %v1296_v9  ;;  %v1222_v10 = vpop.trf.xlu1  ;;  %3158 = vmatprep.mubr.msk.bf16.mxu1 %vm3473_vm1, %v3472_v25 }
 0x181   : > { %3153 = vmatmul.mubr.msk.bf16.vlgmr.msra.gmra.mrb[8].mxu0 %vm1166_vm3, %v1222_v10  ;;  %3168 = vmatprep.subr.bf16.mxu1 %v3472_v25 }
 0x182   : > { %3163 = vmatpush3.bf16.msra.mxu0 %v1358_v11  ;;  %v1284_v12 = vpop.trf.xlu0  ;;  %3164 = vmatprep.mubr.msk.bf16.mxu0 %vm3473_vm1, %v3472_v25 }
 0x183   : > { %3174 = vmatprep.subr.bf16.mxu0 %v3472_v25 }
 0x186   : > { %v1346_v13 = vpop.trf.xlu0 }
 0x187   : > { %3159 = vmatmul.mubr.msk.bf16.vlgmr.msra.gmra.mrb[8].mxu1 %vm1166_vm3, %v1284_v12 }
 0x188   : > { %3170 = vmatprep.mubr.msk.bf16.mxu1 %vm3473_vm1, %v3472_v25 }
 0x189   : > { %3165 = vmatmul.mubr.msk.bf16.vlgmr.msra.gmra.mrb[12].mxu0 %vm1166_vm3, %v1346_v13 }
 0x18a   : > { %3176 = vmatprep.mubr.msk.bf16.mxu0 %vm3473_vm1, %v3472_v25 }
 0x252   : > { %v1208_v14 = vpop.f32.mrb[4].mxu1 }
 0x253   : > { %v3148_v15 = vpop.f32.mrb[5].mxu1  ;;  %v1401_v16 = vsel %vm1400_vm4, %v1208_v14, -inf }
 0x254   : > { %v1270_v17 = vpop.f32.mrb[8].mxu0  ;;  %1402 = vmax.xlane.f32.xlu1 %v1401_v16  ;;  %v1211_v18 = vpop.f32.mrb[6].mxu1 }
 0x255   : > { %v3149_v19 = vpop.f32.mrb[7].mxu1  ;;  %v3154_v20 = vpop.f32.mrb[9].mxu0  ;;  %v1404_v21 = vsel %vm1400_vm4, %v1270_v17, -inf }
 0x256   : > { %v1273_v22 = vpop.f32.mrb[10].mxu0  ;;  %1405 = vmax.xlane.f32.xlu0 %v1404_v21 }
 0x257   : > { %v3155_v23 = vpop.f32.mrb[11].mxu0 }
 0x25a   : > { %v1332_v24 = vpop.f32.mrb[8].mxu1 }
 0x25b   : > { %v3160_v26 = vpop.f32.mrb[9].mxu1  ;;  %v1407_v27 = vsel %vm1400_vm4, %v1332_v24, -inf }
 0x25c   : > { %1408 = vmax.xlane.f32.xlu1 %v1407_v27  ;;  %v1335_v28 = vpop.f32.mrb[10].mxu1  ;;  %v1394_v29 = vpop.f32.mrb[12].mxu0 }
 0x25d   : > { %v3161_v30 = vpop.f32.mrb[11].mxu1  ;;  %v3166_v31 = vpop.f32.mrb[13].mxu0  ;;  %v1410_v32 = vsel %vm1400_vm4, %v1394_v29, -inf }
 0x25e   : > { %1411 = vmax.xlane.f32.xlu0 %v1410_v32  ;;  %v1397_v33 = vpop.f32.mrb[14].mxu0  ;;  %v3353_v30 = vld [vmem:[%s4170_s0] sm:$0xff]  }
 0x25f   : > { %v3167_v34 = vpop.f32.mrb[15].mxu0  ;;  %v1671_v31 = vsel %vm899_vm0, %v3353_v30, 0 }
 0x26d   : > { %1052 = vperm.xlu1 %3346, %v855_v35  }
 0x2e1   : > { %v1403_v36 = vpop.xlane.xlu1 %1402 }
 0x2e2   : > { %v1413_v37 = vsub.f32 %v1208_v14, %v1403_v36  ;;  %v3354_v36 = vld [vmem:[%s4170_s0 + $0x8] sm:$0xff]  }
 0x2e3   : > { %v1406_v38 = vpop.xlane.xlu0 %1405 }
 0x2e4   : > { %v1417_v39 = vmul.f32 1.442695, %v1413_v37  ;;  %v1414_v40 = vsub.f32 %v1270_v17, %v1406_v38  ;;  %v1674_v37 = vsel %vm899_vm0, %v3354_v36, 0  ;;  %v3356_v36 = vld [vmem:[%s4111_s12 + $0x8] sm:$0xff]  }
 0x2e6   : > { %3369 = vpow2.f32 %v1417_v39  ;;  %v1419_v41 = vmul.f32 1.442695, %v1414_v40 }
 0x2e8   : > { %3371 = vpow2.f32 %v1419_v41 }
 0x2e9   : > { %v1409_v42 = vpop.xlane.xlu1 %1408 }
 0x2ea   : > { %v1415_v43 = vsub.f32 %v1332_v24, %v1409_v42 }
 0x2eb   : > { %v1412_v44 = vpop.xlane.xlu0 %1411 }
 0x2ec   : > { %v1421_v45 = vmul.f32 1.442695, %v1415_v43  ;;  %v1416_v46 = vsub.f32 %v1394_v29, %v1412_v44 }
 0x2ed   : > { %v1053_v47 = vpop.permute.xlu1 %1052 }
 0x2ee   : > { %3373 = vpow2.f32 %v1421_v45  ;;  %v1423_v48 = vmul.f32 1.442695, %v1416_v46  ;;  %v1124_v49 = vadd.f32 %v3742_v61, %v1053_v47  ;;  %v857_v61 = vld [vmem:[%s4165_s4 + $0x50] sm:$0xff] }
 0x2f0   : > { %v3370_v50 = vpop.eup %3369  ;;  %3375 = vpow2.f32 %v1423_v48  ;;  %v1146_v51 = vpack.c.bf16 %v1124_v49, %v1124_v49 }
 0x2f1   : > { %v1425_v52 = vsel %vm1400_vm4, %v3370_v50, 0.0 }
 0x2f2   : > { %v3372_v53 = vpop.eup %3371  ;;  %v1453_v54 = vsel %vm1400_vm4, %v1146_v51, 0  ;;  %1426 = vadd.xlane.f32.xlu1 %v1425_v52 }
 0x2f3   : > { %3169 = vmatpush3.bf16.xpose.msra.mxu1 %v1453_v54  ;;  %v1428_v55 = vsel %vm1400_vm4, %v3372_v53, 0.0 }
 0x2f4   : > { %1429 = vadd.xlane.f32.xlu0 %v1428_v55  ;;  %3180 = vmatprep.subr.bf16.mxu1 %v3472_v25 }
 0x2f8   : > { %v3374_v56 = vpop.eup %3373 }
 0x2f9   : > { %v1431_v57 = vsel %vm1400_vm4, %v3374_v56, 0.0 }
 0x2fa   : > { %v3376_v58 = vpop.eup %3375  ;;  %1432 = vadd.xlane.f32.xlu1 %v1431_v57  ;;  %v3012_v57 = vld [vmem:[%s4108_s9] ss:$0 sm:$0xff] }
 0x2fb   : > { %v1434_v59 = vsel %vm1400_vm4, %v3376_v58, 0.0 }
 0x2fc   : > { %1435 = vadd.xlane.f32.xlu0 %v1434_v59 }
 0x30b   : > { %1062 = vperm.xlu1 %3346, %v857_v61  }
 0x30f   : > { %1067 = vperm.xlu1 %3346, %v858_v63  }
 0x312   : > { %1057 = vperm.xlu0 %3345, %v856_v1  }
 0x37f   : > { %v1427_v2 = vpop.xlane.xlu1 %1426 }
 0x380   : > { %3377 = vrcp.f32 %v1427_v2 }
 0x381   : > { %v1430_v4 = vpop.xlane.xlu0 %1429 }
 0x387   : > { %v1433_v3 = vpop.xlane.xlu1 %1432 }
 0x388   : > { %3379 = vrcp.f32 %v1433_v3 }
 0x389   : > { %3381 = vrcp.f32 %v1430_v4  ;;  %v1436_v11 = vpop.xlane.xlu0 %1435  ;;  %v1761_v4 = vld [vmem:[%s4112_s13 + $0x8] sm:$0xff] }
 0x38a   : > { %v3378_v7 = vpop.eup %3377  ;;  %3383 = vrcp.f32 %v1436_v11 }
 0x38b   : > { %v1441_v8 = vmul.f32 %v3378_v7, %v3370_v50  ;;  %v1063_v9 = vpop.permute.xlu1 %1062  ;;  %v1762_v7 = vld [vmem:[%s4112_s13 + $0x10] sm:$0xff] }
 0x38c   : > { %v1132_v10 = vadd.f32 %v3740_v60, %v1063_v9 }
 0x38d   : > { %v1445_v12 = vpack.c.bf16 %v1441_v8, %v1441_v8  ;;  %v1764_v8 = vld [vmem:[%s4112_s13 + $0x20] sm:$0xff] }
 0x38e   : > { %v1148_v13 = vpack.c.bf16 %v1132_v10, %v1132_v10 }
 0x38f   : > { %3171 = vmatmul.mubr.msk.bf16.vlgmr.msra.gmra.mrb[12].mxu1 %vm1400_vm4, %v1445_v12  ;;  %v1068_v60 = vpop.permute.xlu1 %1067 }
 0x390   : > { %v1545_v14 = vsel %vm1400_vm4, %v1148_v13, 0  ;;  %3182 = vmatprep.mubr.msk.bf16.mxu1 %vm3473_vm1, %v3472_v25  ;;  %v1135_v22 = vadd.f32 %v3744_v62, %v1068_v60 }
 0x391   : > { %3181 = vmatpush3.bf16.xpose.msra.mxu1 %v1545_v14  ;;  %v1058_v15 = vpop.permute.xlu0 %1057  ;;  %v1760_v14 = vld [vmem:[%s4112_s13] sm:$0xff] }
 0x392   : > { %v3380_v16 = vpop.eup %3379  ;;  %v1127_v17 = vadd.f32 %v3746_v0, %v1058_v15  ;;  %3192 = vmatprep.subr.bf16.mxu1 %v3472_v25  ;;  %v1149_v0 = vpack.c.bf16 %v1135_v22, %v1135_v22  ;;  %v1763_v15 = vld [vmem:[%s4112_s13 + $0x18] sm:$0xff]  ;;  %v3016_v22 = vld [vmem:[%s4109_s10] ss:$0 sm:$0xff] }
 0x393   : > { %v1443_v18 = vmul.f32 %v3380_v16, %v3374_v56  ;;  %v3382_v20 = vpop.eup %3381  ;;  %v1765_v16 = vld [vmem:[%s4112_s13 + $0x28] sm:$0xff] }
 0x394   : > { %v1147_v19 = vpack.c.bf16 %v1127_v17, %v1127_v17  ;;  %v1442_v24 = vmul.f32 %v3382_v20, %v3372_v53  ;;  %v3384_v27 = vpop.eup %3383  ;;  %v1591_v28 = vsel %vm1400_vm4, %v1149_v0, 0  ;;  %v1767_v17 = vld [vmem:[%s4112_s13 + $0x38] sm:$0xff]  ;;  %v826_v0 = vld [vmem:[%s806_s30] sm:$0xff] }
 0x395   : > { %v1447_v21 = vpack.c.bf16 %v1443_v18, %v1443_v18  ;;  %v1444_v62 = vmul.f32 %v3384_v27, %v3376_v58  ;;  %v3355_v18 = vld [vmem:[%s4111_s12] sm:$0xff]  }
 0x396   : > { %v1499_v23 = vsel %vm1400_vm4, %v1147_v19, 0  ;;  %v1446_v26 = vpack.c.bf16 %v1442_v24, %v1442_v24  ;;  %v3017_v24 = vld [vmem:[%s4110_s11] ss:$0 sm:$0xff] }
 0x397   : > { %3175 = vmatpush3.bf16.xpose.msra.mxu0 %v1499_v23  ;;  %v1448_v29 = vpack.c.bf16 %v1444_v62, %v1444_v62  ;;  %v829_v27 = vld [vmem:[%s815_s25] sm:$0xff] }
 0x398   : > { %3183 = vmatmul.mubr.msk.bf16.vlgmr.msra.gmra.mrb[16].mxu1 %vm1400_vm4, %v1447_v21  ;;  %3186 = vmatprep.subr.bf16.mxu0 %v3472_v25  ;;  %v1746_v30 = vadd.f32 %v829_v27, %v826_v0 }
 0x399   : > { %3196 = vmatprep.mubr.msk.bf16.mxu1 %vm3473_vm1, %v3472_v25  ;;  %3193 = vmatpush3.bf16.xpose.msra.mxu1 %v1671_v31 }
 0x39a   : > { %3194 = vmatprep.subr.bf16.mxu1 %v3472_v25 }
 0x39e   : > { %3177 = vmatmul.mubr.msk.bf16.vlgmr.msra.gmra.mrb[16].mxu0 %vm1400_vm4, %v1446_v26  ;;  %v827_v26 = vld [vmem:[%s806_s30 + $0x8] sm:$0xff]  ;;  %s4180_s30 = sld [smem:[#allocation27_spill]] }
 0x39f   : > { %3187 = vmatpush3.bf16.xpose.msra.mxu0 %v1591_v28  ;;  %3188 = vmatprep.mubr.msk.bf16.mxu0 %vm3473_vm1, %v3472_v25  ;;  %v830_v28 = vld [vmem:[%s815_s25 + $0x8] sm:$0xff]  ;;  %s4175_s25 = sld [smem:[#allocation25_spill]] }
 0x3a0   : > { %v1747_v31 = vadd.f32 %v830_v28, %v827_v26 }
 0x3a1   : > { %3195 = vmatpush3.bf16.xpose.msra.mxu1 %v1674_v37  ;;  %v3357_v37 = vld [vmem:[%s4111_s12 + $0x10] sm:$0xff]  }
 0x3a6   : > { %3189 = vmatmul.mubr.msk.bf16.vlgmr.msra.gmra.mrb[20].mxu0 %vm1400_vm4, %v1448_v29 }
 0x3a7   : > { %3202 = vmatprep.mubr.msk.bf16.mxu0 %vm899_vm0, %v3355_v18 }
 0x462   : > { %v1489_v32 = vpop.f32.mrb[12].mxu1 }
 0x463   : > { %v3172_v33 = vpop.f32.mrb[13].mxu1 }
 0x464   : > { %v1492_v34 = vpop.f32.mrb[14].mxu1 }
 0x465   : > { %v3173_v35 = vpop.f32.mrb[15].mxu1  ;;  %v1780_v34 = vpack.c.bf16 %v1747_v31, %v1746_v30 }
 0x46b   : > { %v1581_v38 = vpop.f32.mrb[16].mxu1 }
 0x46c   : > { %1638 = vrot.lane.b32.xlu1 %v1581_v38, %s3474_s8  ;;  %v3184_v39 = vpop.f32.mrb[17].mxu1  ;;  %v1911_v38 = vsel %vm899_vm0, %v1780_v34, 0 }
 0x46d   : > { %v1584_v40 = vpop.f32.mrb[18].mxu1  ;;  %v1781_v39 = vpack.c.bf16 %v827_v26, %v826_v0 }
 0x46e   : > { %v3185_v41 = vpop.f32.mrb[19].mxu1 }
 0x46f   : > { %3299 = vmatprep.subr.msk.bf16.mxu1 %vm899_vm0, %v1781_v39  ;;  %v1999_v40 = vsel %vm899_vm0, %v1781_v39, 0  ;;  %v3359_v41 = vld [vmem:[%s4111_s12 + $0x20] sm:$0xff]  }
 0x471   : > { %v1535_v42 = vpop.f32.mrb[16].mxu0 }
 0x472   : > { %1634 = vrot.lane.b32.xlu0 %v1535_v42, %s3475_s5  ;;  %v3178_v43 = vpop.f32.mrb[17].mxu0  ;;  %v3360_v42 = vld [vmem:[%s4111_s12 + $0x28] sm:$0xff]  }
 0x473   : > { %v1538_v44 = vpop.f32.mrb[18].mxu0 }
 0x474   : > { %v3179_v45 = vpop.f32.mrb[19].mxu0 }
 0x479   : > { %v1627_v46 = vpop.f32.mrb[20].mxu0 }
 0x47a   : > { %1642 = vrot.lane.b32.xlu0 %v1627_v46, %s3476_s28  ;;  %v3190_v47 = vpop.f32.mrb[21].mxu0 }
 0x47b   : > { %v1630_v48 = vpop.f32.mrb[22].mxu0 }
 0x47c   : > { %v3191_v49 = vpop.f32.mrb[23].mxu0 }
 0x4de   : > { %v1639_v52 = vpop.permute.xlu1 %1638 }
 0x4e4   : > { %v1635_v50 = vpop.permute.xlu0 %1634 }
 0x4e5   : > { %v1645_v51 = vsel %vm1166_vm3, %v1489_v32, %v1635_v50 }
 0x4e6   : > { %v1647_v53 = vsel %vm1646_vm5, %v1645_v51, %v1639_v52 }
 0x4ec   : > { %v1643_v54 = vpop.permute.xlu0 %1642 }
 0x4ed   : > { %v1649_v55 = vsel %vm1648_vm6, %v1647_v53, %v1643_v54 }
 0x4ee   : > { %v1650_v56 = vpack.c.bf16 %v1649_v55, %v1649_v55 }
 0x4f0   : > { %3197 = vmatmul.mubr.msk.bf16.vlgmr.msra.gmra.mrb[20].mxu1 %vm899_vm0, %v1650_v56 }
 0x4f1   : > { %3213 = vmatpush3.bf16.xpose.msra.mxu1 %v1999_v40  ;;  %3214 = vmatprep.mubr.msk.bf16.mxu1 %vm899_vm0, %v3359_v41 }
 0x4f2   : > { %3224 = vmatprep.subr.bf16.mxu1 %v3472_v25 }
 0x4f8   : > { %3215 = vmatmul.mubr.msk.bf16.vlgmr.msra.gmra.mrb[24].mxu1 %vm899_vm0, %v3360_v42 }
 0x4f9   : > { %3226 = vmatprep.mubr.msk.bf16.mxu1 %vm3473_vm1, %v3472_v25 }
 0x5c3   : > { %v1710_v58 = vpop.f32.mrb[20].mxu1 }
 0x5c4   : > { %v1711_v59 = vadd.f32 %v3012_v57, %v1710_v58  ;;  %v3198_v61 = vpop.f32.mrb[21].mxu1 }
 0x5c5   : > { %v1713_v63 = vpop.f32.mrb[22].mxu1 }
 0x5c6   : > { %v3199_v1 = vpop.f32.mrb[23].mxu1  ;;  %v1716_v2 = vadd.f32 %v1711_v59, %v3677_v5  ;;  %v1766_v5 = vld [vmem:[%s4112_s13 + $0x30] sm:$0xff] }
 0x5c8   : > { %v1717_v3 = vsel %vm899_vm0, %v1716_v2, 0.0 }
 0x5c9   : > { %1718 = vadd.xlane.f32.xlu1 %v1717_v3 }
 0x5da   : > { %1789 = vperm.xlu1 %3346, %v1761_v4  }
 0x5de   : > { %1794 = vperm.xlu1 %3346, %v1762_v7  }
 0x5e2   : > { %1876 = vperm.xlu1 %3346, %v1764_v8  }
 0x5e6   : > { %1886 = vperm.xlu1 %3346, %v1766_v5  }
 0x656   : > { %v1719_v9 = vpop.xlane.xlu1 %1718 }
 0x657   : > { %v1721_v10 = vmul.f32 0.03125, %v1719_v9 }
 0x659   : > { %v1722_v11 = vsub.f32 %v1716_v2, %v1721_v10 }
 0x65a   : > { %v1790_v44 = vpop.permute.xlu1 %1789 }
 0x65b   : > { %v1723_v12 = vmul.f32 %v1722_v11, %v1722_v11 }
 0x65d   : > { %v1724_v13 = vsel %vm899_vm0, %v1723_v12, 0.0 }
 0x65e   : > { %1725 = vadd.xlane.f32.xlu0 %v1724_v13  ;;  %v1795_v50 = vpop.permute.xlu1 %1794 }
 0x662   : > { %v1877_v1 = vpop.permute.xlu1 %1876 }
 0x674   : > { %1784 = vperm.xlu0 %3345, %v1760_v14  }
 0x678   : > { %1799 = vperm.xlu0 %3345, %v1763_v15   ;;  %v3908_v15 = vpop.f32.mrb[24].mxu1 }
 0x67c   : > { %1881 = vperm.xlu0 %3345, %v1765_v16   ;;  %v1887_v16 = vpop.permute.xlu1 %1886 }
 0x680   : > { %1891 = vperm.xlu0 %3345, %v1767_v17   ;;  %v3910_v17 = vpop.f32.mrb[25].mxu1 }
 0x6eb   : > { %v1726_v60 = vpop.xlane.xlu0 %1725 }
 0x6ec   : > { %v1727_v19 = vmul.f32 0.03125, %v1726_v60  ;;  %v3912_v60 = vpop.f32.mrb[26].mxu1 }
 0x6ee   : > { %v1728_v20 = vadd.f32 1e-05, %v1727_v19 }
 0x6f0   : > { %3385 = vrsqrt.f32 %v1728_v20  ;;  %v3914_v20 = vpop.f32.mrb[27].mxu1 }
 0x6f3   : > { %v1785_v43 = vpop.permute.xlu0 %1784 }
 0x6f7   : > { %v1800_v47 = vpop.permute.xlu0 %1799 }
 0x6fa   : > { %v3386_v21 = vpop.eup %3385 }
 0x6fb   : > { %v1730_v23 = vmul.f32 %v3386_v21, %v1722_v11  ;;  %v1882_v8 = vpop.permute.xlu0 %1881 }
 0x6fd   : > { %v1737_v62 = vmul.f32 %v3016_v22, %v1730_v23 }
 0x6ff   : > { %v3868_v29 = vadd.f32 %v3017_v24, %v1737_v62  ;;  %v1892_v19 = vpop.permute.xlu0 %1891 }
 0x701   : > { %v1745_v32 = vadd.f32 %v3868_v29, %v3679_v6  ;;  %v3358_v6 = vld [vmem:[%s4111_s12 + $0x18] sm:$0xff]  }
 0x703   : > { %v1779_v33 = vpack.c.bf16 %v1745_v32, %v1745_v32 }
 0x705   : > { %3297 = vmatprep.subr.msk.bf16.mxu0 %vm899_vm0, %v1779_v33  ;;  %v1819_v35 = vsel %vm899_vm0, %v1779_v33, 0 }
 0x706   : > { %3201 = vmatpush3.bf16.xpose.msra.mxu0 %v1819_v35 }
 0x707   : > { %3298 = vmatprep.subr.msk.bf16.mxu0 %vm899_vm0, %v1780_v34 }
 0x70d   : > { %3203 = vmatmul.mubr.msk.bf16.vlgmr.msra.gmra.mrb[24].mxu0 %vm899_vm0, %v3356_v36 }
 0x70e   : > { %3207 = vmatpush3.bf16.xpose.msra.mxu0 %v1911_v38  ;;  %3208 = vmatprep.mubr.msk.bf16.mxu0 %vm899_vm0, %v3357_v37 }
 0x70f   : > { %3218 = vmatprep.subr.bf16.mxu0 %v3472_v25 }
 0x715   : > { %3209 = vmatmul.mubr.msk.bf16.vlgmr.msra.gmra.mrb[28].mxu0 %vm899_vm0, %v3358_v6 }
 0x716   : > { %3220 = vmatprep.mubr.msk.bf16.mxu0 %vm3473_vm1, %v3472_v25 }
 0x7e0   : > { %v3204_v45 = vpop.f32.mrb[24].mxu0 }
 0x7e1   : > { %v1855_v46 = vpop.f32.mrb[25].mxu0  ;;  %v1864_v53 = vadd.f32 %v3204_v45, %v1795_v50  ;;  %v1768_v50 = vld [vmem:[%s4112_s13 + $0x40] sm:$0xff] }
 0x7e2   : > { %v1856_v48 = vadd.f32 %v1855_v46, %v1785_v43  ;;  %v3205_v49 = vpop.f32.mrb[26].mxu0 }
 0x7e3   : > { %v1867_v51 = vadd.f32 %v3205_v49, %v1800_v47  ;;  %v1858_v52 = vpop.f32.mrb[27].mxu0  ;;  %v1872_v59 = vmul.f32 0.35355338, %v1864_v53  ;;  %v1769_v49 = vld [vmem:[%s4112_s13 + $0x48] sm:$0xff] }
 0x7e4   : > { %v1870_v54 = vmul.f32 0.35355338, %v1856_v48  ;;  %v1859_v55 = vadd.f32 %v1858_v52, %v1790_v44 }
 0x7e5   : > { %v1873_v57 = vmul.f32 0.35355338, %v1867_v51  ;;  %v2052_v9 = vpack.c.bf16 %v1872_v59, %v1872_v59 }
 0x7e6   : > { %v2050_v56 = vpack.c.bf16 %v1870_v54, %v1870_v54  ;;  %v1871_v58 = vmul.f32 0.35355338, %v1859_v55 }
 0x7e7   : > { %v2053_v3 = vpack.c.bf16 %v1873_v57, %v1873_v57 }
 0x7e8   : > { %v2051_v61 = vpack.c.bf16 %v1871_v58, %v1871_v58  ;;  %v3210_v63 = vpop.f32.mrb[28].mxu0  ;;  %2062 = vxpose.xlu1.c.b16.start.end [1/1] (short) (narrow) %v2050_v56, 16 }
 0x7e9   : > { %v1947_v2 = vpop.f32.mrb[29].mxu0  ;;  %v1956_v18 = vadd.f32 %v3210_v63, %v1887_v16 }
 0x7ea   : > { %v1948_v4 = vadd.f32 %v1947_v2, %v1877_v1  ;;  %v3211_v7 = vpop.f32.mrb[30].mxu0  ;;  %2124 = vxpose.xlu0.c.b16.start.end [1/1] (short) (narrow) %v2051_v61, 16 }
 0x7eb   : > { %v1950_v5 = vpop.f32.mrb[31].mxu0  ;;  %v1959_v21 = vadd.f32 %v3211_v7, %v1892_v19  ;;  %v2056_v22 = vpack.c.bf16 %v1956_v18, %v1956_v18 }
 0x7ec   : > { %v2054_v10 = vpack.c.bf16 %v1948_v4, %v1948_v4  ;;  %v1951_v11 = vadd.f32 %v1950_v5, %v1882_v8  ;;  %2248 = vxpose.xlu1.c.b16.start.end [1/1] (short) (narrow) %v2053_v3, 16 }
 0x7ed   : > { %v2057_v23 = vpack.c.bf16 %v1959_v21, %v1959_v21  ;;  %v2206_v0 = vsel %vm1170_vm2, %v2056_v22, 0  ;;  %v1771_v21 = vld [vmem:[%s4112_s13 + $0x58] sm:$0xff] }
 0x7ee   : > { %v2082_v12 = vsel %vm1170_vm2, %v2054_v10, 0  ;;  %v2055_v13 = vpack.c.bf16 %v1951_v11, %v1951_v11  ;;  %2186 = vxpose.xlu0.c.b16.start.end [1/1] (short) (narrow) %v2052_v9, 16 }
 0x7ef   : > { %3219 = vmatpush3.bf16.msra.mxu0 %v2082_v12  ;;  %v2268_v27 = vsel %vm1170_vm2, %v2057_v23, 0 }
 0x7f0   : > { %v2144_v14 = vsel %vm1170_vm2, %v2055_v13, 0  ;;  %3230 = vmatprep.subr.bf16.mxu0 %v3472_v25 }
 0x7f1   : > { %3225 = vmatpush3.bf16.msra.mxu1 %v2144_v14 }
 0x7f2   : > { %3236 = vmatprep.subr.bf16.mxu1 %v3472_v25 }
 0x84e   : > { %v2070_v24 = vpop.trf.xlu1 }
 0x84f   : > { %3221 = vmatmul.mubr.msk.bf16.vlgmr.msra.gmra.mrb[32].mxu0 %vm1166_vm3, %v2070_v24 }
 0x850   : > { %3231 = vmatpush3.bf16.msra.mxu0 %v2206_v0  ;;  %v2132_v26 = vpop.trf.xlu0  ;;  %3232 = vmatprep.mubr.msk.bf16.mxu0 %vm3473_vm1, %v3472_v25 }
 0x851   : > { %3227 = vmatmul.mubr.msk.bf16.vlgmr.msra.gmra.mrb[28].mxu1 %vm1166_vm3, %v2132_v26  ;;  %3242 = vmatprep.subr.bf16.mxu0 %v3472_v25 }
 0x852   : > { %3237 = vmatpush3.bf16.msra.mxu1 %v2268_v27  ;;  %3238 = vmatprep.mubr.msk.bf16.mxu1 %vm3473_vm1, %v3472_v25  ;;  %v2256_v62 = vpop.trf.xlu1 }
 0x853   : > { %3248 = vmatprep.subr.bf16.mxu1 %v3472_v25 }
 0x854   : > { %v2194_v28 = vpop.trf.xlu0 }
 0x857   : > { %3233 = vmatmul.mubr.msk.bf16.vlgmr.msra.gmra.mrb[36].mxu0 %vm1166_vm3, %v2194_v28 }
 0x858   : > { %3244 = vmatprep.mubr.msk.bf16.mxu0 %vm3473_vm1, %v3472_v25 }
 0x859   : > { %3239 = vmatmul.mubr.msk.bf16.vlgmr.msra.gmra.mrb[32].mxu1 %vm1166_vm3, %v2256_v62 }
 0x85a   : > { %3250 = vmatprep.mubr.msk.bf16.mxu1 %vm3473_vm1, %v3472_v25 }
 0x922   : > { %v2118_v30 = vpop.f32.mrb[32].mxu0 }
 0x923   : > { %v3222_v31 = vpop.f32.mrb[33].mxu0  ;;  %v2310_v32 = vsel %vm1646_vm5, %v2118_v30, -inf }
 0x924   : > { %v2180_v33 = vpop.f32.mrb[28].mxu1  ;;  %2311 = vmax.xlane.f32.xlu0 %v2310_v32  ;;  %v2121_v34 = vpop.f32.mrb[34].mxu0 }
 0x925   : > { %v3223_v35 = vpop.f32.mrb[35].mxu0  ;;  %v3228_v36 = vpop.f32.mrb[29].mxu1  ;;  %v2313_v37 = vsel %vm1646_vm5, %v2180_v33, -inf }
 0x926   : > { %v2183_v38 = vpop.f32.mrb[30].mxu1  ;;  %2314 = vmax.xlane.f32.xlu1 %v2313_v37 }
 0x927   : > { %v3229_v6 = vpop.f32.mrb[31].mxu1 }
 0x92a   : > { %v2242_v39 = vpop.f32.mrb[36].mxu0 }
 0x92b   : > { %v3234_v40 = vpop.f32.mrb[37].mxu0  ;;  %v2316_v41 = vsel %vm1646_vm5, %v2242_v39, -inf }
 0x92c   : > { %2317 = vmax.xlane.f32.xlu0 %v2316_v41  ;;  %v2245_v42 = vpop.f32.mrb[38].mxu0  ;;  %v2304_v43 = vpop.f32.mrb[32].mxu1 }
 0x92d   : > { %v3235_v44 = vpop.f32.mrb[39].mxu0  ;;  %v3240_v45 = vpop.f32.mrb[33].mxu1  ;;  %v2319_v46 = vsel %vm1646_vm5, %v2304_v43, -inf }
 0x92e   : > { %2320 = vmax.xlane.f32.xlu1 %v2319_v46  ;;  %v2307_v47 = vpop.f32.mrb[34].mxu1  ;;  %v3362_v45 = vld [vmem:[%s4113_s14 + $0x8] sm:$0xff]  }
 0x92f   : > { %v3241_v48 = vpop.f32.mrb[35].mxu1  ;;  %v2581_v46 = vsel %vm899_vm0, %v3362_v45, 0 }
 0x93f   : > { %1969 = vperm.xlu1 %3346, %v1769_v49  }
 0x942   : > { %1964 = vperm.xlu0 %3345, %v1768_v50  }
 0x9b1   : > { %v2312_v51 = vpop.xlane.xlu0 %2311 }
 0x9b2   : > { %v2322_v52 = vsub.f32 %v2118_v30, %v2312_v51 }
 0x9b3   : > { %v2315_v53 = vpop.xlane.xlu1 %2314 }
 0x9b4   : > { %v2326_v54 = vmul.f32 1.442695, %v2322_v52  ;;  %v2323_v55 = vsub.f32 %v2180_v33, %v2315_v53 }
 0x9b6   : > { %3387 = vpow2.f32 %v2326_v54  ;;  %v2328_v56 = vmul.f32 1.442695, %v2323_v55 }
 0x9b8   : > { %3389 = vpow2.f32 %v2328_v56 }
 0x9b9   : > { %v2318_v57 = vpop.xlane.xlu0 %2317 }
 0x9ba   : > { %v2324_v58 = vsub.f32 %v2242_v39, %v2318_v57 }
 0x9bb   : > { %v2321_v59 = vpop.xlane.xlu1 %2320 }
 0x9bc   : > { %v2330_v61 = vmul.f32 1.442695, %v2324_v58  ;;  %v2325_v63 = vsub.f32 %v2304_v43, %v2321_v59  ;;  %v3361_v43 = vld [vmem:[%s4113_s14] sm:$0xff]  }
 0x9bd   : > { %v2578_v44 = vsel %vm899_vm0, %v3361_v43, 0 }
 0x9be   : > { %3391 = vpow2.f32 %v2330_v61  ;;  %v2332_v1 = vmul.f32 1.442695, %v2325_v63 }
 0x9bf   : > { %v1970_v2 = vpop.permute.xlu1 %1969 }
 0x9c0   : > { %v3388_v3 = vpop.eup %3387  ;;  %3393 = vpow2.f32 %v2332_v1  ;;  %v2039_v4 = vadd.f32 %v3914_v20, %v1970_v2  ;;  %v1770_v20 = vld [vmem:[%s4112_s13 + $0x50] sm:$0xff] }
 0x9c1   : > { %v1965_v7 = vpop.permute.xlu0 %1964  ;;  %v2334_v8 = vsel %vm1646_vm5, %v3388_v3, 0.0 }
 0x9c2   : > { %v3390_v5 = vpop.eup %3389  ;;  %v2059_v9 = vpack.c.bf16 %v2039_v4, %v2039_v4  ;;  %v2036_v10 = vadd.f32 %v3910_v17, %v1965_v7  ;;  %2335 = vadd.xlane.f32.xlu0 %v2334_v8 }
 0x9c3   : > { %v2337_v11 = vsel %vm1646_vm5, %v3390_v5, 0.0 }
 0x9c4   : > { %v2408_v12 = vsel %vm1646_vm5, %v2059_v9, 0  ;;  %v2058_v13 = vpack.c.bf16 %v2036_v10, %v2036_v10  ;;  %2338 = vadd.xlane.f32.xlu1 %v2337_v11  ;;  %v3038_v10 = vld [vmem:[%s4114_s15] ss:$0 sm:$0xff] }
 0x9c5   : > { %3249 = vmatpush3.bf16.xpose.msra.mxu1 %v2408_v12 }
 0x9c6   : > { %v2362_v14 = vsel %vm1646_vm5, %v2058_v13, 0  ;;  %3260 = vmatprep.subr.bf16.mxu1 %v3472_v25 }
 0x9c7   : > { %3243 = vmatpush3.bf16.xpose.msra.mxu0 %v2362_v14 }
 0x9c8   : > { %v3392_v16 = vpop.eup %3391  ;;  %3254 = vmatprep.subr.bf16.mxu0 %v3472_v25 }
 0x9c9   : > { %v2340_v18 = vsel %vm1646_vm5, %v3392_v16, 0.0 }
 0x9ca   : > { %v3394_v19 = vpop.eup %3393  ;;  %2341 = vadd.xlane.f32.xlu0 %v2340_v18 }
 0x9cb   : > { %v2343_v17 = vsel %vm1646_vm5, %v3394_v19, 0.0 }
 0x9cc   : > { %2344 = vadd.xlane.f32.xlu1 %v2343_v17  ;;  %v3363_v17 = vld [vmem:[%s4117_s18] sm:$0xff]  }
 0x9dd   : > { %1974 = vperm.xlu1 %3346, %v1770_v20   ;;  %v2698_v20 = vsel %vm899_vm0, %v3363_v17, 0 }
 0x9e0   : > { %1979 = vperm.xlu0 %3345, %v1771_v21  }
 0xa4f   : > { %v2336_v22 = vpop.xlane.xlu0 %2335 }
 0xa50   : > { %3395 = vrcp.f32 %v2336_v22 }
 0xa51   : > { %v2339_v23 = vpop.xlane.xlu1 %2338 }
 0xa52   : > { %3397 = vrcp.f32 %v2339_v23 }
 0xa57   : > { %v2342_v24 = vpop.xlane.xlu0 %2341 }
 0xa58   : > { %3399 = vrcp.f32 %v2342_v24 }
 0xa59   : > { %v2345_v0 = vpop.xlane.xlu1 %2344 }
 0xa5a   : > { %v3396_v26 = vpop.eup %3395  ;;  %3401 = vrcp.f32 %v2345_v0 }
 0xa5b   : > { %v2350_v27 = vmul.f32 %v3396_v26, %v3388_v3 }
 0xa5c   : > { %v3398_v28 = vpop.eup %3397 }
 0xa5d   : > { %v2351_v62 = vmul.f32 %v3398_v28, %v3390_v5  ;;  %v1975_v30 = vpop.permute.xlu1 %1974  ;;  %v2354_v31 = vpack.c.bf16 %v2350_v27, %v2350_v27  ;;  %v3365_v27 = vld [vmem:[%s4117_s18 + $0x10] sm:$0xff]  }
 0xa5e   : > { %v2044_v32 = vadd.f32 %v3908_v15, %v1975_v30  ;;  %v2704_v28 = vsel %vm899_vm0, %v3365_v27, 0 }
 0xa5f   : > { %3245 = vmatmul.mubr.msk.bf16.vlgmr.msra.gmra.mrb[40].mxu0 %vm1646_vm5, %v2354_v31  ;;  %v1980_v33 = vpop.permute.xlu0 %1979  ;;  %v2355_v34 = vpack.c.bf16 %v2351_v62, %v2351_v62  ;;  %v3366_v62 = vld [vmem:[%s4117_s18 + $0x18] sm:$0xff]   ;;  %v3367_v31 = vld [vmem:[%s4119_s20] sm:$0xff]  }
 0xa60   : > { %v2060_v35 = vpack.c.bf16 %v2044_v32, %v2044_v32  ;;  %v2047_v36 = vadd.f32 %v3912_v60, %v1980_v33  ;;  %3256 = vmatprep.mubr.msk.bf16.mxu0 %vm3473_vm1, %v3472_v25  ;;  %v2707_v30 = vsel %vm899_vm0, %v3366_v62, 0  ;;  %v2772_v32 = vsel %vm2767_vm7, %v3367_v31, 0 }
 0xa61   : > { %3251 = vmatmul.mubr.msk.bf16.vlgmr.msra.gmra.mrb[36].mxu1 %vm1646_vm5, %v2355_v34 }
 0xa62   : > { %v3400_v37 = vpop.eup %3399  ;;  %v2454_v38 = vsel %vm1646_vm5, %v2060_v35, 0  ;;  %v2061_v6 = vpack.c.bf16 %v2047_v36, %v2047_v36  ;;  %3262 = vmatprep.mubr.msk.bf16.mxu1 %vm3473_vm1, %v3472_v25 }
 0xa63   : > { %3255 = vmatpush3.bf16.xpose.msra.mxu0 %v2454_v38  ;;  %v2352_v39 = vmul.f32 %v3400_v37, %v3392_v16  ;;  %v3042_v37 = vld [vmem:[%s4115_s16] ss:$0 sm:$0xff] }
 0xa64   : > { %v3402_v15 = vpop.eup %3401  ;;  %v2500_v40 = vsel %vm1646_vm5, %v2061_v6, 0  ;;  %3266 = vmatprep.subr.bf16.mxu0 %v3472_v25  ;;  %v3043_v6 = vld [vmem:[%s4173_s27] ss:$0 sm:$0xff] }
 0xa65   : > { %3261 = vmatpush3.bf16.xpose.msra.mxu1 %v2500_v40  ;;  %v2353_v60 = vmul.f32 %v3402_v15, %v3394_v19  ;;  %v2356_v41 = vpack.c.bf16 %v2352_v39, %v2352_v39 }
 0xa66   : > { %3274 = vmatprep.subr.bf16.mxu1 %v3472_v25 }
 0xa67   : > { %v2357_v42 = vpack.c.bf16 %v2353_v60, %v2353_v60 }
 0xa6a   : > { %3257 = vmatmul.mubr.msk.bf16.vlgmr.msra.gmra.mrb[44].mxu0 %vm1646_vm5, %v2356_v41  ;;  %v3044_v41 = vld [vmem:[%s4174_s3] ss:$0 sm:$0xff] }
 0xa6b   : > { %3270 = vmatprep.mubr.msk.bf16.mxu0 %vm3473_vm1, %v3472_v25  ;;  %3267 = vmatpush3.bf16.xpose.msra.mxu0 %v2578_v44 }
 0xa6c   : > { %3263 = vmatmul.mubr.msk.bf16.vlgmr.msra.gmra.mrb[40].mxu1 %vm1646_vm5, %v2357_v42  ;;  %3268 = vmatprep.subr.bf16.mxu0 %v3472_v25 }
 0xa6d   : > { %3282 = vmatprep.mubr.msk.bf16.mxu1 %vm3473_vm1, %v3472_v25  ;;  %3275 = vmatpush3.bf16.xpose.msra.mxu1 %v2698_v20 }
 0xa6e   : > { %3276 = vmatprep.subr.bf16.mxu1 %v3472_v25 }
 0xa73   : > { %3269 = vmatpush3.bf16.xpose.msra.mxu0 %v2581_v46 }
 0xa74   : > { %3286 = vmatprep.subr.bf16.mxu0 %v3472_v25 }
 0xb32   : > { %v2398_v47 = vpop.f32.mrb[40].mxu0 }
 0xb33   : > { %v3246_v48 = vpop.f32.mrb[41].mxu0 }
 0xb34   : > { %v2401_v49 = vpop.f32.mrb[42].mxu0  ;;  %v2444_v50 = vpop.f32.mrb[36].mxu1 }
 0xb35   : > { %v3247_v51 = vpop.f32.mrb[43].mxu0  ;;  %2543 = vrot.lane.b32.xlu1 %v2444_v50, %s3475_s5  ;;  %v3252_v52 = vpop.f32.mrb[37].mxu1  ;;  %v3050_v49 = vld [vmem:[%s4175_s25] ss:$0 sm:$0xff]  ;;  %s797_s5 = scalar_lea.vmem [#allocation2], %s2983_s26 }
 0xb36   : > { %v2447_v53 = vpop.f32.mrb[38].mxu1 }
 0xb37   : > { %v3253_v54 = vpop.f32.mrb[39].mxu1 }
 0xb3d   : > { %v2490_v55 = vpop.f32.mrb[44].mxu0 }
 0xb3e   : > { %2547 = vrot.lane.b32.xlu0 %v2490_v55, %s3474_s8  ;;  %v3258_v56 = vpop.f32.mrb[45].mxu0  ;;  %s3057_s8 = sshll.u32 %s4177_s22, 7  ;;  %s3477_s22 = smov [#allocation2]  }
 0xb3f   : > { %v2493_v57 = vpop.f32.mrb[46].mxu0  ;;  %v2536_v58 = vpop.f32.mrb[40].mxu1  ;;  %s4056_s25 = scalar_lea.hbm %s4181_s29, %s3057_s8  ;;  %s3411_s26 = sshll.u32 %s3477_s22, 4  ;;  %s3412_s26 = int_to_ptr.vmem [resolvable:$false] %s3411_s26 }
 0xb40   : > { %2551 = vrot.lane.b32.xlu1 %v2536_v58, %s3476_s28  ;;  %v3259_v59 = vpop.f32.mrb[47].mxu0  ;;  %v3264_v61 = vpop.f32.mrb[41].mxu1  ;;  %s2860_s28 = sshll.u32 %s797_s5, 4  ;;  %s3413_s17 = scalar_lea.vmem %s3412_s26, 256  ;;  %s4058_s28 = int_to_ptr.vmem [resolvable:$true] %s2860_s28 }
 0xb41   : > { %v2539_v63 = vpop.f32.mrb[42].mxu1  ;;  %s3407_s6 = scalar_lea.vmem %s4058_s28, 128  ;;  %p3414_p0 = scmp.lt.s32.totalorder %s4058_s28, %s3412_s26 }
 0xb42   : > { %v3265_v1 = vpop.f32.mrb[43].mxu1  ;;  %p3408_p11 = scmp.ne.s32.totalorder %s4058_s28, %s3407_s6  ;;  %p3415_p1 = scmp.lt.s32.totalorder %s3413_s17, %s3407_s6 }
 0xb44   : > { %p3409_p12 = pnand %p3408_p11, %p3641_p5  ;;  %p3416_p2 = por %p3415_p1, %p3414_p0 }
 0xb46   : > { %p3410_p13 = pneg %p3409_p12 }
 0xb48   : > { %p3417_p3 = pnand %p3416_p2, %p3410_p13 }
 0xba7   : > { %v2544_v2 = vpop.permute.xlu1 %2543 }
 0xba8   : > { %v2554_v3 = vsel %vm1166_vm3, %v2398_v47, %v2544_v2 }
 0xbb0   : > { %v2548_v4 = vpop.permute.xlu0 %2547 }
 0xbb1   : > { %v2555_v7 = vsel %vm1646_vm5, %v2554_v3, %v2548_v4 }
 0xbb2   : > { %v2552_v8 = vpop.permute.xlu1 %2551 }
 0xbb3   : > { %v2556_v5 = vsel %vm1648_vm6, %v2555_v7, %v2552_v8  ;;  %v3054_v7 = vld [vmem:[%s4179_s19] ss:$0 sm:$0xff] }
 0xbb4   : > { %v2557_v9 = vpack.c.bf16 %v2556_v5, %v2556_v5  ;;  %v3055_v5 = vld [vmem:[%s4180_s30] ss:$0 sm:$0xff] }
 0xbb6   : > { %3271 = vmatmul.mubr.msk.bf16.vlgmr.msra.gmra.mrb[48].mxu0 %vm899_vm0, %v2557_v9 }
 0xbb7   : > { %3290 = vmatprep.mubr.msk.bf16.mxu0 %vm3473_vm1, %v3472_v25  ;;  %3287 = vmatpush3.bf16.xpose.msra.mxu0 %v2772_v32 }
 0xbb8   : > { %3288 = vmatprep.subr.bf16.mxu0 %v3472_v25 }
 0xc89   : > { %v2617_v11 = vpop.f32.mrb[48].mxu0 }
 0xc8a   : > { %v2618_v12 = vadd.f32 %v3038_v10, %v2617_v11  ;;  %v3272_v13 = vpop.f32.mrb[49].mxu0 }
 0xc8b   : > { %v2620_v14 = vpop.f32.mrb[50].mxu0 }
 0xc8c   : > { %v3273_v16 = vpop.f32.mrb[51].mxu0  ;;  %v2623_v18 = vadd.f32 %v2618_v12, %v3868_v29  ;;  %v3364_v29 = vld [vmem:[%s4117_s18 + $0x8] sm:$0xff]  }
 0xc8d   : > { %v2701_v26 = vsel %vm899_vm0, %v3364_v29, 0 }
 0xc8e   : > { %v2624_v19 = vsel %vm899_vm0, %v2623_v18, 0.0  ;;  %3277 = vmatpush3.bf16.xpose.msra.mxu1 %v2701_v26 }
 0xc8f   : > { %2625 = vadd.xlane.f32.xlu0 %v2624_v19  ;;  %3278 = vmatprep.subr.bf16.mxu1 %v3472_v25 }
 0xc96   : > { %3279 = vmatpush3.bf16.xpose.msra.mxu1 %v2704_v28 }
 0xc97   : > { %3280 = vmatprep.subr.bf16.mxu1 %v3472_v25  ;;  %v3368_v25 = vld [vmem:[%s4119_s20 + $0x8] sm:$0xff]  }
 0xc98   : > { %v2775_v60 = vsel %vm2767_vm7, %v3368_v25, 0 }
 0xc99   : > { %3289 = vmatpush3.bf16.xpose.msra.mxu0 %v2775_v60 }
 0xc9e   : > { %3281 = vmatpush3.bf16.xpose.msra.mxu1 %v2707_v30 }
 0xd1c   : > { %v2626_v21 = vpop.xlane.xlu0 %2625 }
 0xd1d   : > { %v2627_v22 = vmul.f32 0.03125, %v2626_v21 }
 0xd1f   : > { %v2628_v23 = vsub.f32 %v2623_v18, %v2627_v22 }
 0xd21   : > { %v2629_v24 = vmul.f32 %v2628_v23, %v2628_v23 }
 0xd23   : > { %v2630_v0 = vsel %vm899_vm0, %v2629_v24, 0.0 }
 0xd24   : > { %2631 = vadd.xlane.f32.xlu1 %v2630_v0 }
 0xdb1   : > { %v2632_v33 = vpop.xlane.xlu1 %2631 }
 0xdb2   : > { %v2633_v34 = vmul.f32 0.03125, %v2632_v33 }
 0xdb4   : > { %v2634_v35 = vadd.f32 1e-05, %v2633_v34 }
 0xdb6   : > { %3403 = vrsqrt.f32 %v2634_v35 }
 0xdc0   : > { %v3404_v36 = vpop.eup %3403 }
 0xdc1   : > { %v2636_v38 = vmul.f32 %v3404_v36, %v2628_v23 }
 0xdc3   : > { %v2643_v15 = vmul.f32 %v3042_v37, %v2636_v38 }
 0xdc5   : > { %v2650_v39 = vadd.f32 %v3043_v6, %v2643_v15 }
 0xdc7   : > { %v2667_v40 = vpack.c.bf16 %v2650_v39, %v2650_v39 }
 0xdc9   : > { %3283 = vmatmul.mubr.msk.bf16.vlgmr.msra.gmra.mrb[44].mxu1 %vm899_vm0, %v2667_v40 }
 0xe9c   : > { %v2743_v42 = vpop.f32.mrb[44].mxu1 }
 0xe9d   : > { %v2744_v43 = vadd.f32 %v3044_v41, %v2743_v42  ;;  %v3284_v44 = vpop.f32.mrb[45].mxu1 }
 0xe9e   : > { %v2746_v45 = vpop.f32.mrb[46].mxu1 }
 0xe9f   : > { %v2749_v46 = vmax.f32 %v2744_v43, 0.0  ;;  %v3285_v47 = vpop.f32.mrb[47].mxu1 }
 0xea1   : > { %v2750_v48 = vpack.c.bf16 %v2749_v46, %v2749_v46 }
 0xea3   : > { %3291 = vmatmul.mubr.msk.bf16.vlgmr.msra.gmra.mrb[52].mxu0 %vm2767_vm7, %v2750_v48 }
 0xf76   : > { %v2811_v50 = vpop.f32.mrb[52].mxu0 }
 0xf77   : > { %v2812_v51 = vadd.f32 %v3050_v49, %v2811_v50  ;;  %v3292_v52 = vpop.f32.mrb[53].mxu0 }
 0xf78   : > { %v2814_v53 = vpop.f32.mrb[54].mxu0 }
 0xf79   : > { %v3293_v54 = vpop.f32.mrb[55].mxu0  ;;  %v2817_v55 = vadd.f32 %v2812_v51, %v2650_v39 }
 0xf7b   : > { %v2818_v56 = vsel %vm899_vm0, %v2817_v55, 0.0 }
 0xf7c   : > { %2819 = vadd.xlane.f32.xlu0 %v2818_v56 }
0x1009   : > { %v2820_v57 = vpop.xlane.xlu0 %2819 }
0x100a   : > { %v2821_v58 = vmul.f32 0.03125, %v2820_v57 }
0x100c   : > { %v2822_v59 = vsub.f32 %v2817_v55, %v2821_v58 }
0x100e   : > { %v2823_v61 = vmul.f32 %v2822_v59, %v2822_v59 }
0x1010   : > { %v2824_v63 = vsel %vm899_vm0, %v2823_v61, 0.0 }
0x1011   : > { %2825 = vadd.xlane.f32.xlu0 %v2824_v63 }
0x109e   : > { %v2826_v1 = vpop.xlane.xlu0 %2825 }
0x109f   : > { %v2827_v2 = vmul.f32 0.03125, %v2826_v1 }
0x10a1   : > { %v2828_v3 = vadd.f32 1e-05, %v2827_v2 }
0x10a3   : > { %3405 = vrsqrt.f32 %v2828_v3 }
0x10ad   : > { %v3406_v4 = vpop.eup %3405 }
0x10ae   : > { %v2830_v8 = vmul.f32 %v3406_v4, %v2822_v59 }
0x10b0   : > { %v2837_v9 = vmul.f32 %v3054_v7, %v2830_v8 }
0x10b2   : > { %v2844_v10 = vadd.f32 %v3055_v5, %v2837_v9 }
0x10b4   : > { %2845 = vst.msk [vmem:[%s797_s5] sm:$0xff] %vm899_vm0, %v2844_v10 }
0x10b5   : > { %3420 = shalt.err (!%p3417_p3)
}
0x10b6   : > { %s3421_s23 = scalar_lea.hbm %s4056_s25, 128  ;;  %s3425_s27 = scalar_lea.hbm %s4181_s29, 256 }
0x10b7   : > { %p3422_p4 = scmp.ne.s32.totalorder %s4056_s25, %s3421_s23  ;;  %p3426_p9 = scmp.lt.u32.totalorder %s4056_s25, %s4181_s29 }
0x10b8   : > { %p3427_p10 = scmp.lt.u32.totalorder %s3425_s27, %s3421_s23  ;;  %p3429_p12 = scmp.lt.u32.totalorder %s3421_s23, %s4056_s25 }
0x10b9   : > { %p3423_p7 = pnand %p3422_p4, %p3641_p5 }
0x10ba   : > { %p3428_p11 = por %p3427_p10, %p3426_p9 }
0x10bb   : > { %p3424_p8 = pneg %p3423_p7 }
0x10bc   : > { %p3430_p13 = por %p3429_p12, %p3428_p11 }
0x10be   : > { %p3431_p0 = pnand %p3430_p13, %p3424_p8 }
0x10c0   : > { %3434 = shalt.err (!%p3431_p0)
}
0x10c1   : > { %3300 = dma.vmem_to_hbm [thread:$0]  (%p3641_p5), %s4058_s28, 128, %s4056_s25, %s2847_s24  }
0x10c2 PF: > { %s4182_s5 = sld [smem:[#allocation8_spill]]  ;;  %s4183_s3 = sld [smem:[#allocation5_spill]] }
0x10c8   : > { %p3306_p1 = scmp.ge.s32.totalorder %s4182_s5, 2  ;;  %s2872_s6 = sand.u32 1, %s4183_s3  }
0x10c9   : > { %s2873_s22 = scalar_lea.sflag [#allocation3], %s2872_s6 }
0x10ca   : > { %p3303_p2 = pnand %p3306_p1, %p3645_p6 }
0x10cc   : > { %3452 = dma.done.wait (!%p3303_p2), %s2873_s22, 128  }
0x10cd   : > { %3454 = vsyncadd (!%p3303_p2), %s2873_s22, 4294967168  ;;  %s4185_s28 = sld [smem:[#allocation10_spill]]  ;;  %s4186_s5 = sld [smem:[#allocation6_spill]] }
0x10ce   : > { %s4187_s26 = sld [smem:[#allocation7_spill]]  ;;  %s4188_s27 = sld [smem:[#allocation11_spill]] }
0x10d3   : > { %p34_p3 = scmp.ge.s32.totalorder %s4185_s28, 4  }
0x10d5   :  { %36 = sbr.rel (!%p34_p3) target bundleno = 19 (0x13), region = 166 }
0x10dc   :  { %2878 = vsyncpa [#allocation3], 1 }
0x10dd   :  { %2880 = vsyncpa [#allocation3 + $0x1], 1 }

</bundles_post_ra>
